<compile_context>
chip_gen: v5e
topology: v5e:2x2
jax: 0.10.0
libtpu: 0.0.40
codegen_flags: <defaults>
</compile_context>

<pallas_src>
import functools

import jax
import jax.numpy as jnp
from jax import lax
from jax.experimental import pallas as pl
from jax.experimental.pallas import tpu as pltpu


def _fused_encoder_kernel(x_ref, m_ref, w1_ref, b1_ref, w2_ref, b2_ref,
                          w3_ref, b3_ref, o_ref, *, W):
    """Fused 3x(conv3x3 'same' + lReLU) for one image.

    Layout: channels on sublanes, flattened spatial HW = H*W (multiple of 128)
    on lanes.

    x_ref : (1, C0p, HW) f32   input image (C0p = Cin padded to a multiple of 8)
    m_ref : (9, 1, HW)   f32   0/1 boundary masks, one per 3x3 tap ('same' pad)
    wX_ref: (CoutX, 9*CinX) bf16  tap-major prestacked weights
    bX_ref: (CoutX, 1)   f32   bias
    o_ref : (1, C3, HW)        lane-dense output block (last dim = HW)
    """
    hw = x_ref.shape[-1]
    # Tap t = (dh+1)*3 + (dw+1); neighbour of pixel p is p + dh*W + dw.
    offs = [dh * W + dw for dh in (-1, 0, 1) for dw in (-1, 0, 1)]

    def conv3x3_lrelu(act, w_ref, b_ref):
        # Build the 9 shifted-and-masked taps with XLU rolls + VPU mask muls
        # (no MXU work), then do a single K = 9*Cin MXU contraction.
        pieces = []
        for t, off in enumerate(offs):
            if off == 0:                                  # centre tap: identity
                pieces.append(act)
            else:
                # out[p] = act[p + off]  ->  jnp.roll-style shift of -off.
                shifted = pltpu.roll(act, (-off) % hw, 1)
                pieces.append(shifted * m_ref[t])         # zero out-of-image
        stacked = jnp.concatenate(pieces, axis=0)         # (9*Cin, HW) f32
        acc = jnp.dot(w_ref[...], stacked.astype(jnp.bfloat16),
                      preferred_element_type=jnp.float32) # (Cout, HW) f32
        acc = acc + b_ref[...]                            # (Cout,1) broadcast
        return jnp.maximum(acc * 0.2, acc)                # lReLU = max(0.2x, x)

    a = x_ref[0]                                          # (C0p, HW) f32
    a = conv3x3_lrelu(a, w1_ref, b1_ref)                  # (16, HW) stays on-chip
    a = conv3x3_lrelu(a, w2_ref, b2_ref)                  # (32, HW) stays on-chip
    a = conv3x3_lrelu(a, w3_ref, b3_ref)                  # (C3, HW)
    o_ref[0] = a.astype(o_ref.dtype)


def _make_boundary_masks(H, W, dtype=jnp.float32):
    """mask[t, 0, p] = 1 iff the (dh, dw)-neighbour of pixel p lies inside the
    image, t = (dh+1)*3 + (dw+1).  Shared by all three conv layers."""
    hw = H * W
    p = jnp.arange(hw)
    ph, pw = p // W, p % W
    masks = []
    for dh in (-1, 0, 1):
        for dw in (-1, 0, 1):
            valid = ((ph + dh >= 0) & (ph + dh < H) &
                     (pw + dw >= 0) & (pw + dw < W))
            masks.append(valid.astype(dtype))
    return jnp.stack(masks).reshape(9, 1, hw)             # (9, 1, HW)


@jax.jit
def encoder_forward(params, x_nchw):
    """params: [(w (Cout,Cin,3,3) f32, b (Cout,) f32)] * 3; x: (N,Cin,H,W) f32."""
    N, c0, H, W = x_nchw.shape
    hw = H * W
    (w1, b1), (w2, b2), (w3, b3) = params
    c1, c2, c3 = w1.shape[0], w2.shape[0], w3.shape[0]

    # Pad input channels to a multiple of 8 so the in-kernel f32 tap concat is
    # sublane-aligned (zero channels x zero weights contribute nothing).
    c0p = -(-c0 // 8) * 8
    x_flat = x_nchw.reshape(N, c0, hw)                    # free (contiguous)
    if c0p != c0:
        x_flat = jnp.pad(x_flat, ((0, 0), (0, c0p - c0), (0, 0)))
        w1 = jnp.pad(w1, ((0, 0), (0, c0p - c0), (0, 0), (0, 0)))

    masks = _make_boundary_masks(H, W)                    # constant-folded by XLA

    def prep(w, b):
        cout, cin = w.shape[:2]
        # (Cout,Cin,3,3) -> (Cout, 9*Cin), tap-major (t = kh*3+kw), bf16 for MXU.
        ws = jnp.transpose(w, (0, 2, 3, 1)).reshape(cout, 9 * cin).astype(jnp.bfloat16)
        return ws, b.reshape(cout, 1).astype(jnp.float32)

    w1s, b1c = prep(w1, b1)
    w2s, b2c = prep(w2, b2)
    w3s, b3c = prep(w3, b3)

    kernel = functools.partial(_fused_encoder_kernel, W=W)

    out_flat = pl.pallas_call(
        kernel,
        out_shape=jax.ShapeDtypeStruct((N, c3, hw), x_nchw.dtype),
        grid=(N,),
        in_specs=[
            pl.BlockSpec((1, c0p, hw), lambda n: (n, 0, 0)),   # image n
            pl.BlockSpec((9, 1, hw), lambda n: (0, 0, 0)),     # boundary masks
            pl.BlockSpec((c1, 9 * c0p), lambda n: (0, 0)),     # layer-1 weights
            pl.BlockSpec((c1, 1), lambda n: (0, 0)),           # layer-1 bias
            pl.BlockSpec((c2, 9 * c1), lambda n: (0, 0)),      # layer-2 weights
            pl.BlockSpec((c2, 1), lambda n: (0, 0)),           # layer-2 bias
            pl.BlockSpec((c3, 9 * c2), lambda n: (0, 0)),      # layer-3 weights
            pl.BlockSpec((c3, 1), lambda n: (0, 0)),           # layer-3 bias
        ],
        out_specs=pl.BlockSpec((1, c3, hw), lambda n: (n, 0, 0)),
        compiler_params=pltpu.CompilerParams(
            dimension_semantics=("parallel",)),                # both TCs on v7x
    )(x_flat, masks, w1s, b1c, w2s, b2c, w3s, b3c)

    return out_flat.reshape(N, c3, H, W)                  # back to NCHW (free)


def init_encoder_params(key, in_channel, out_channel):
    """Deterministic synthetic parameters; PyTorch Conv2d layout (Cout,Cin,3,3)."""
    chans = [(in_channel, 16), (16, 32), (32, out_channel)]
    params = []
    for i, (cin, cout) in enumerate(chans):
        kw_, kb_ = jax.random.split(jax.random.fold_in(key, i))
        fan_in = cin * 3 * 3
        scale = 1.0 / jnp.sqrt(jnp.float32(fan_in))
        w = jax.random.uniform(kw_, (cout, cin, 3, 3), jnp.float32, -scale, scale)
        b = jax.random.uniform(kb_, (cout,), jnp.float32, -scale, scale)
        params.append((w, b))
    return params


def encoder_reference(params, x_nchw):
    """Pure-JAX reference with the same bf16-operand / f32-accumulate math."""
    h = x_nchw
    for w, b in params:
        h = lax.conv_general_dilated(
            h.astype(jnp.bfloat16), w.astype(jnp.bfloat16),
            window_strides=(1, 1), padding="SAME",
            dimension_numbers=("NCHW", "OIHW", "NCHW"),
            preferred_element_type=jnp.float32,
        ) + b.reshape(1, -1, 1, 1)
        h = jnp.maximum(h * 0.2, h)
    return h


if __name__ == "__main__":
    in_channel, out_channel = 4, 8
    N, H, W = 2, 16, 16

    key = jax.random.PRNGKey(0)
    kx, kp = jax.random.split(key)

    x_nchw = jax.random.normal(kx, (N, in_channel, H, W), jnp.float32)
    params = init_encoder_params(kp, in_channel, out_channel)

    y = encoder_forward(params, x_nchw)
    jax.block_until_ready(y)

    y_ref = encoder_reference(params, x_nchw)
    assert y.shape == (N, out_channel, H, W)
    assert jnp.allclose(y, y_ref, rtol=1e-3, atol=1e-3), float(jnp.max(jnp.abs(y - y_ref)))

    print("KERNEL_OK")
</pallas_src>

<mosaic_0001>
module attributes {stable_mosaic.version = 11 : i64} {
  func.func @_fused_encoder_kernel(%arg0: i32, %arg1: memref<1x8x256xf32, #tpu.memory_space<vmem>>, %arg2: memref<9x1x256xf32, #tpu.memory_space<vmem>>, %arg3: memref<16x72xbf16, #tpu.memory_space<vmem>>, %arg4: memref<16x1xf32, #tpu.memory_space<vmem>>, %arg5: memref<32x144xbf16, #tpu.memory_space<vmem>>, %arg6: memref<32x1xf32, #tpu.memory_space<vmem>>, %arg7: memref<8x288xbf16, #tpu.memory_space<vmem>>, %arg8: memref<8x1xf32, #tpu.memory_space<vmem>>, %arg9: memref<1x8x256xf32, #tpu.memory_space<vmem>>) attributes {dimension_semantics = [#tpu.dimension_semantics<parallel>], iteration_bounds = array<i64: 2>, scalar_prefetch = 0 : i64, scratch_operands = 0 : i64, tpu.core_type = #tpu.core_type<tc>, window_params = [{transform_indices = @transform_0, window_bounds = array<i64: 1, 8, 256>}, {pipeline_mode = #tpu.pipeline_mode<synchronous>, transform_indices = @transform_1, window_bounds = array<i64: 9, 1, 256>}, {pipeline_mode = #tpu.pipeline_mode<synchronous>, transform_indices = @transform_2, window_bounds = array<i64: 16, 72>}, {pipeline_mode = #tpu.pipeline_mode<synchronous>, transform_indices = @transform_3, window_bounds = array<i64: 16, 1>}, {pipeline_mode = #tpu.pipeline_mode<synchronous>, transform_indices = @transform_4, window_bounds = array<i64: 32, 144>}, {pipeline_mode = #tpu.pipeline_mode<synchronous>, transform_indices = @transform_5, window_bounds = array<i64: 32, 1>}, {pipeline_mode = #tpu.pipeline_mode<synchronous>, transform_indices = @transform_6, window_bounds = array<i64: 8, 288>}, {pipeline_mode = #tpu.pipeline_mode<synchronous>, transform_indices = @transform_7, window_bounds = array<i64: 8, 1>}, {transform_indices = @transform_8, window_bounds = array<i64: 1, 8, 256>}]} {
    %c0 = arith.constant 0 : index
    %c0_0 = arith.constant 0 : index
    %c0_1 = arith.constant 0 : index
    %0 = vector.load %arg1[%c0, %c0_0, %c0_1] : memref<1x8x256xf32, #tpu.memory_space<vmem>>, vector<1x8x256xf32>
    %1 = vector.shape_cast %0 : vector<1x8x256xf32> to vector<8x256xf32>
    %c17_i32 = arith.constant 17 : i32
    %2 = tpu.dynamic_rotate %1 by %c17_i32 dim 1 : vector<8x256xf32>, i32 -> vector<8x256xf32>
    %c0_2 = arith.constant 0 : index
    %c0_3 = arith.constant 0 : index
    %c0_4 = arith.constant 0 : index
    %3 = vector.load %arg2[%c0_2, %c0_3, %c0_4] : memref<9x1x256xf32, #tpu.memory_space<vmem>>, vector<1x1x256xf32>
    %4 = vector.shape_cast %3 : vector<1x1x256xf32> to vector<1x256xf32>
    %5 = vector.broadcast %4 : vector<1x256xf32> to vector<8x256xf32>
    %6 = arith.mulf %2, %5 : vector<8x256xf32>
    %c16_i32 = arith.constant 16 : i32
    %7 = tpu.dynamic_rotate %1 by %c16_i32 dim 1 : vector<8x256xf32>, i32 -> vector<8x256xf32>
    %c1 = arith.constant 1 : index
    %c0_5 = arith.constant 0 : index
    %c0_6 = arith.constant 0 : index
    %8 = vector.load %arg2[%c1, %c0_5, %c0_6] : memref<9x1x256xf32, #tpu.memory_space<vmem>>, vector<1x1x256xf32>
    %9 = vector.shape_cast %8 : vector<1x1x256xf32> to vector<1x256xf32>
    %10 = vector.broadcast %9 : vector<1x256xf32> to vector<8x256xf32>
    %11 = arith.mulf %7, %10 : vector<8x256xf32>
    %c15_i32 = arith.constant 15 : i32
    %12 = tpu.dynamic_rotate %1 by %c15_i32 dim 1 : vector<8x256xf32>, i32 -> vector<8x256xf32>
    %c2 = arith.constant 2 : index
    %c0_7 = arith.constant 0 : index
    %c0_8 = arith.constant 0 : index
    %13 = vector.load %arg2[%c2, %c0_7, %c0_8] : memref<9x1x256xf32, #tpu.memory_space<vmem>>, vector<1x1x256xf32>
    %14 = vector.shape_cast %13 : vector<1x1x256xf32> to vector<1x256xf32>
    %15 = vector.broadcast %14 : vector<1x256xf32> to vector<8x256xf32>
    %16 = arith.mulf %12, %15 : vector<8x256xf32>
    %c1_i32 = arith.constant 1 : i32
    %17 = tpu.dynamic_rotate %1 by %c1_i32 dim 1 : vector<8x256xf32>, i32 -> vector<8x256xf32>
    %c3 = arith.constant 3 : index
    %c0_9 = arith.constant 0 : index
    %c0_10 = arith.constant 0 : index
    %18 = vector.load %arg2[%c3, %c0_9, %c0_10] : memref<9x1x256xf32, #tpu.memory_space<vmem>>, vector<1x1x256xf32>
    %19 = vector.shape_cast %18 : vector<1x1x256xf32> to vector<1x256xf32>
    %20 = vector.broadcast %19 : vector<1x256xf32> to vector<8x256xf32>
    %21 = arith.mulf %17, %20 : vector<8x256xf32>
    %c255_i32 = arith.constant 255 : i32
    %22 = tpu.dynamic_rotate %1 by %c255_i32 dim 1 : vector<8x256xf32>, i32 -> vector<8x256xf32>
    %c5 = arith.constant 5 : index
    %c0_11 = arith.constant 0 : index
    %c0_12 = arith.constant 0 : index
    %23 = vector.load %arg2[%c5, %c0_11, %c0_12] : memref<9x1x256xf32, #tpu.memory_space<vmem>>, vector<1x1x256xf32>
    %24 = vector.shape_cast %23 : vector<1x1x256xf32> to vector<1x256xf32>
    %25 = vector.broadcast %24 : vector<1x256xf32> to vector<8x256xf32>
    %26 = arith.mulf %22, %25 : vector<8x256xf32>
    %c241_i32 = arith.constant 241 : i32
    %27 = tpu.dynamic_rotate %1 by %c241_i32 dim 1 : vector<8x256xf32>, i32 -> vector<8x256xf32>
    %c6 = arith.constant 6 : index
    %c0_13 = arith.constant 0 : index
    %c0_14 = arith.constant 0 : index
    %28 = vector.load %arg2[%c6, %c0_13, %c0_14] : memref<9x1x256xf32, #tpu.memory_space<vmem>>, vector<1x1x256xf32>
    %29 = vector.shape_cast %28 : vector<1x1x256xf32> to vector<1x256xf32>
    %30 = vector.broadcast %29 : vector<1x256xf32> to vector<8x256xf32>
    %31 = arith.mulf %27, %30 : vector<8x256xf32>
    %c240_i32 = arith.constant 240 : i32
    %32 = tpu.dynamic_rotate %1 by %c240_i32 dim 1 : vector<8x256xf32>, i32 -> vector<8x256xf32>
    %c7 = arith.constant 7 : index
    %c0_15 = arith.constant 0 : index
    %c0_16 = arith.constant 0 : index
    %33 = vector.load %arg2[%c7, %c0_15, %c0_16] : memref<9x1x256xf32, #tpu.memory_space<vmem>>, vector<1x1x256xf32>
    %34 = vector.shape_cast %33 : vector<1x1x256xf32> to vector<1x256xf32>
    %35 = vector.broadcast %34 : vector<1x256xf32> to vector<8x256xf32>
    %36 = arith.mulf %32, %35 : vector<8x256xf32>
    %c239_i32 = arith.constant 239 : i32
    %37 = tpu.dynamic_rotate %1 by %c239_i32 dim 1 : vector<8x256xf32>, i32 -> vector<8x256xf32>
    %c8 = arith.constant 8 : index
    %c0_17 = arith.constant 0 : index
    %c0_18 = arith.constant 0 : index
    %38 = vector.load %arg2[%c8, %c0_17, %c0_18] : memref<9x1x256xf32, #tpu.memory_space<vmem>>, vector<1x1x256xf32>
    %39 = vector.shape_cast %38 : vector<1x1x256xf32> to vector<1x256xf32>
    %40 = vector.broadcast %39 : vector<1x256xf32> to vector<8x256xf32>
    %41 = arith.mulf %37, %40 : vector<8x256xf32>
    %42 = tpu.concatenate %6, %11, %16, %21, %1, %26, %31, %36, %41 in 0 : vector<8x256xf32>, vector<8x256xf32>, vector<8x256xf32>, vector<8x256xf32>, vector<8x256xf32>, vector<8x256xf32>, vector<8x256xf32>, vector<8x256xf32>, vector<8x256xf32> -> vector<72x256xf32>
    %c0_19 = arith.constant 0 : index
    %c0_20 = arith.constant 0 : index
    %43 = vector.load %arg3[%c0_19, %c0_20] : memref<16x72xbf16, #tpu.memory_space<vmem>>, vector<16x72xbf16>
    %44 = arith.truncf %42 : vector<72x256xf32> to vector<72x256xbf16>
    %cst = arith.constant dense<0.000000e+00> : vector<16x256xf32>
    %45 = tpu.matmul %43, %44, %cst {dimension_numbers = #tpu.dot_dimension_numbers<[1], [0], [0], [1], [0, 0, 1, 1], [], []>} : vector<16x72xbf16>, vector<72x256xbf16>, vector<16x256xf32> -> vector<16x256xf32>
    %c0_21 = arith.constant 0 : index
    %c0_22 = arith.constant 0 : index
    %46 = vector.load %arg4[%c0_21, %c0_22] : memref<16x1xf32, #tpu.memory_space<vmem>>, vector<16x1xf32>
    %47 = vector.broadcast %46 : vector<16x1xf32> to vector<16x256xf32>
    %48 = arith.addf %45, %47 : vector<16x256xf32>
    %cst_23 = arith.constant 2.000000e-01 : f32
    %49 = vector.broadcast %cst_23 : f32 to vector<16x256xf32>
    %50 = arith.mulf %48, %49 : vector<16x256xf32>
    %51 = arith.maximumf %50, %48 : vector<16x256xf32>
    %c17_i32_24 = arith.constant 17 : i32
    %52 = tpu.dynamic_rotate %51 by %c17_i32_24 dim 1 : vector<16x256xf32>, i32 -> vector<16x256xf32>
    %c0_25 = arith.constant 0 : index
    %c0_26 = arith.constant 0 : index
    %c0_27 = arith.constant 0 : index
    %53 = vector.load %arg2[%c0_25, %c0_26, %c0_27] : memref<9x1x256xf32, #tpu.memory_space<vmem>>, vector<1x1x256xf32>
    %54 = vector.shape_cast %53 : vector<1x1x256xf32> to vector<1x256xf32>
    %55 = vector.broadcast %54 : vector<1x256xf32> to vector<16x256xf32>
    %56 = arith.mulf %52, %55 : vector<16x256xf32>
    %c16_i32_28 = arith.constant 16 : i32
    %57 = tpu.dynamic_rotate %51 by %c16_i32_28 dim 1 : vector<16x256xf32>, i32 -> vector<16x256xf32>
    %c1_29 = arith.constant 1 : index
    %c0_30 = arith.constant 0 : index
    %c0_31 = arith.constant 0 : index
    %58 = vector.load %arg2[%c1_29, %c0_30, %c0_31] : memref<9x1x256xf32, #tpu.memory_space<vmem>>, vector<1x1x256xf32>
    %59 = vector.shape_cast %58 : vector<1x1x256xf32> to vector<1x256xf32>
    %60 = vector.broadcast %59 : vector<1x256xf32> to vector<16x256xf32>
    %61 = arith.mulf %57, %60 : vector<16x256xf32>
    %c15_i32_32 = arith.constant 15 : i32
    %62 = tpu.dynamic_rotate %51 by %c15_i32_32 dim 1 : vector<16x256xf32>, i32 -> vector<16x256xf32>
    %c2_33 = arith.constant 2 : index
    %c0_34 = arith.constant 0 : index
    %c0_35 = arith.constant 0 : index
    %63 = vector.load %arg2[%c2_33, %c0_34, %c0_35] : memref<9x1x256xf32, #tpu.memory_space<vmem>>, vector<1x1x256xf32>
    %64 = vector.shape_cast %63 : vector<1x1x256xf32> to vector<1x256xf32>
    %65 = vector.broadcast %64 : vector<1x256xf32> to vector<16x256xf32>
    %66 = arith.mulf %62, %65 : vector<16x256xf32>
    %c1_i32_36 = arith.constant 1 : i32
    %67 = tpu.dynamic_rotate %51 by %c1_i32_36 dim 1 : vector<16x256xf32>, i32 -> vector<16x256xf32>
    %c3_37 = arith.constant 3 : index
    %c0_38 = arith.constant 0 : index
    %c0_39 = arith.constant 0 : index
    %68 = vector.load %arg2[%c3_37, %c0_38, %c0_39] : memref<9x1x256xf32, #tpu.memory_space<vmem>>, vector<1x1x256xf32>
    %69 = vector.shape_cast %68 : vector<1x1x256xf32> to vector<1x256xf32>
    %70 = vector.broadcast %69 : vector<1x256xf32> to vector<16x256xf32>
    %71 = arith.mulf %67, %70 : vector<16x256xf32>
    %c255_i32_40 = arith.constant 255 : i32
    %72 = tpu.dynamic_rotate %51 by %c255_i32_40 dim 1 : vector<16x256xf32>, i32 -> vector<16x256xf32>
    %c5_41 = arith.constant 5 : index
    %c0_42 = arith.constant 0 : index
    %c0_43 = arith.constant 0 : index
    %73 = vector.load %arg2[%c5_41, %c0_42, %c0_43] : memref<9x1x256xf32, #tpu.memory_space<vmem>>, vector<1x1x256xf32>
    %74 = vector.shape_cast %73 : vector<1x1x256xf32> to vector<1x256xf32>
    %75 = vector.broadcast %74 : vector<1x256xf32> to vector<16x256xf32>
    %76 = arith.mulf %72, %75 : vector<16x256xf32>
    %c241_i32_44 = arith.constant 241 : i32
    %77 = tpu.dynamic_rotate %51 by %c241_i32_44 dim 1 : vector<16x256xf32>, i32 -> vector<16x256xf32>
    %c6_45 = arith.constant 6 : index
    %c0_46 = arith.constant 0 : index
    %c0_47 = arith.constant 0 : index
    %78 = vector.load %arg2[%c6_45, %c0_46, %c0_47] : memref<9x1x256xf32, #tpu.memory_space<vmem>>, vector<1x1x256xf32>
    %79 = vector.shape_cast %78 : vector<1x1x256xf32> to vector<1x256xf32>
    %80 = vector.broadcast %79 : vector<1x256xf32> to vector<16x256xf32>
    %81 = arith.mulf %77, %80 : vector<16x256xf32>
    %c240_i32_48 = arith.constant 240 : i32
    %82 = tpu.dynamic_rotate %51 by %c240_i32_48 dim 1 : vector<16x256xf32>, i32 -> vector<16x256xf32>
    %c7_49 = arith.constant 7 : index
    %c0_50 = arith.constant 0 : index
    %c0_51 = arith.constant 0 : index
    %83 = vector.load %arg2[%c7_49, %c0_50, %c0_51] : memref<9x1x256xf32, #tpu.memory_space<vmem>>, vector<1x1x256xf32>
    %84 = vector.shape_cast %83 : vector<1x1x256xf32> to vector<1x256xf32>
    %85 = vector.broadcast %84 : vector<1x256xf32> to vector<16x256xf32>
    %86 = arith.mulf %82, %85 : vector<16x256xf32>
    %c239_i32_52 = arith.constant 239 : i32
    %87 = tpu.dynamic_rotate %51 by %c239_i32_52 dim 1 : vector<16x256xf32>, i32 -> vector<16x256xf32>
    %c8_53 = arith.constant 8 : index
    %c0_54 = arith.constant 0 : index
    %c0_55 = arith.constant 0 : index
    %88 = vector.load %arg2[%c8_53, %c0_54, %c0_55] : memref<9x1x256xf32, #tpu.memory_space<vmem>>, vector<1x1x256xf32>
    %89 = vector.shape_cast %88 : vector<1x1x256xf32> to vector<1x256xf32>
    %90 = vector.broadcast %89 : vector<1x256xf32> to vector<16x256xf32>
    %91 = arith.mulf %87, %90 : vector<16x256xf32>
    %92 = tpu.concatenate %56, %61, %66, %71, %51, %76, %81, %86, %91 in 0 : vector<16x256xf32>, vector<16x256xf32>, vector<16x256xf32>, vector<16x256xf32>, vector<16x256xf32>, vector<16x256xf32>, vector<16x256xf32>, vector<16x256xf32>, vector<16x256xf32> -> vector<144x256xf32>
    %c0_56 = arith.constant 0 : index
    %c0_57 = arith.constant 0 : index
    %93 = vector.load %arg5[%c0_56, %c0_57] : memref<32x144xbf16, #tpu.memory_space<vmem>>, vector<32x144xbf16>
    %94 = arith.truncf %92 : vector<144x256xf32> to vector<144x256xbf16>
    %cst_58 = arith.constant dense<0.000000e+00> : vector<32x256xf32>
    %95 = tpu.matmul %93, %94, %cst_58 {dimension_numbers = #tpu.dot_dimension_numbers<[1], [0], [0], [1], [0, 0, 1, 1], [], []>} : vector<32x144xbf16>, vector<144x256xbf16>, vector<32x256xf32> -> vector<32x256xf32>
    %c0_59 = arith.constant 0 : index
    %c0_60 = arith.constant 0 : index
    %96 = vector.load %arg6[%c0_59, %c0_60] : memref<32x1xf32, #tpu.memory_space<vmem>>, vector<32x1xf32>
    %97 = vector.broadcast %96 : vector<32x1xf32> to vector<32x256xf32>
    %98 = arith.addf %95, %97 : vector<32x256xf32>
    %cst_61 = arith.constant 2.000000e-01 : f32
    %99 = vector.broadcast %cst_61 : f32 to vector<32x256xf32>
    %100 = arith.mulf %98, %99 : vector<32x256xf32>
    %101 = arith.maximumf %100, %98 : vector<32x256xf32>
    %c17_i32_62 = arith.constant 17 : i32
    %102 = tpu.dynamic_rotate %101 by %c17_i32_62 dim 1 : vector<32x256xf32>, i32 -> vector<32x256xf32>
    %c0_63 = arith.constant 0 : index
    %c0_64 = arith.constant 0 : index
    %c0_65 = arith.constant 0 : index
    %103 = vector.load %arg2[%c0_63, %c0_64, %c0_65] : memref<9x1x256xf32, #tpu.memory_space<vmem>>, vector<1x1x256xf32>
    %104 = vector.shape_cast %103 : vector<1x1x256xf32> to vector<1x256xf32>
    %105 = vector.broadcast %104 : vector<1x256xf32> to vector<32x256xf32>
    %106 = arith.mulf %102, %105 : vector<32x256xf32>
    %c16_i32_66 = arith.constant 16 : i32
    %107 = tpu.dynamic_rotate %101 by %c16_i32_66 dim 1 : vector<32x256xf32>, i32 -> vector<32x256xf32>
    %c1_67 = arith.constant 1 : index
    %c0_68 = arith.constant 0 : index
    %c0_69 = arith.constant 0 : index
    %108 = vector.load %arg2[%c1_67, %c0_68, %c0_69] : memref<9x1x256xf32, #tpu.memory_space<vmem>>, vector<1x1x256xf32>
    %109 = vector.shape_cast %108 : vector<1x1x256xf32> to vector<1x256xf32>
    %110 = vector.broadcast %109 : vector<1x256xf32> to vector<32x256xf32>
    %111 = arith.mulf %107, %110 : vector<32x256xf32>
    %c15_i32_70 = arith.constant 15 : i32
    %112 = tpu.dynamic_rotate %101 by %c15_i32_70 dim 1 : vector<32x256xf32>, i32 -> vector<32x256xf32>
    %c2_71 = arith.constant 2 : index
    %c0_72 = arith.constant 0 : index
    %c0_73 = arith.constant 0 : index
    %113 = vector.load %arg2[%c2_71, %c0_72, %c0_73] : memref<9x1x256xf32, #tpu.memory_space<vmem>>, vector<1x1x256xf32>
    %114 = vector.shape_cast %113 : vector<1x1x256xf32> to vector<1x256xf32>
    %115 = vector.broadcast %114 : vector<1x256xf32> to vector<32x256xf32>
    %116 = arith.mulf %112, %115 : vector<32x256xf32>
    %c1_i32_74 = arith.constant 1 : i32
    %117 = tpu.dynamic_rotate %101 by %c1_i32_74 dim 1 : vector<32x256xf32>, i32 -> vector<32x256xf32>
    %c3_75 = arith.constant 3 : index
    %c0_76 = arith.constant 0 : index
    %c0_77 = arith.constant 0 : index
    %118 = vector.load %arg2[%c3_75, %c0_76, %c0_77] : memref<9x1x256xf32, #tpu.memory_space<vmem>>, vector<1x1x256xf32>
    %119 = vector.shape_cast %118 : vector<1x1x256xf32> to vector<1x256xf32>
    %120 = vector.broadcast %119 : vector<1x256xf32> to vector<32x256xf32>
    %121 = arith.mulf %117, %120 : vector<32x256xf32>
    %c255_i32_78 = arith.constant 255 : i32
    %122 = tpu.dynamic_rotate %101 by %c255_i32_78 dim 1 : vector<32x256xf32>, i32 -> vector<32x256xf32>
    %c5_79 = arith.constant 5 : index
    %c0_80 = arith.constant 0 : index
    %c0_81 = arith.constant 0 : index
    %123 = vector.load %arg2[%c5_79, %c0_80, %c0_81] : memref<9x1x256xf32, #tpu.memory_space<vmem>>, vector<1x1x256xf32>
    %124 = vector.shape_cast %123 : vector<1x1x256xf32> to vector<1x256xf32>
    %125 = vector.broadcast %124 : vector<1x256xf32> to vector<32x256xf32>
    %126 = arith.mulf %122, %125 : vector<32x256xf32>
    %c241_i32_82 = arith.constant 241 : i32
    %127 = tpu.dynamic_rotate %101 by %c241_i32_82 dim 1 : vector<32x256xf32>, i32 -> vector<32x256xf32>
    %c6_83 = arith.constant 6 : index
    %c0_84 = arith.constant 0 : index
    %c0_85 = arith.constant 0 : index
    %128 = vector.load %arg2[%c6_83, %c0_84, %c0_85] : memref<9x1x256xf32, #tpu.memory_space<vmem>>, vector<1x1x256xf32>
    %129 = vector.shape_cast %128 : vector<1x1x256xf32> to vector<1x256xf32>
    %130 = vector.broadcast %129 : vector<1x256xf32> to vector<32x256xf32>
    %131 = arith.mulf %127, %130 : vector<32x256xf32>
    %c240_i32_86 = arith.constant 240 : i32
    %132 = tpu.dynamic_rotate %101 by %c240_i32_86 dim 1 : vector<32x256xf32>, i32 -> vector<32x256xf32>
    %c7_87 = arith.constant 7 : index
    %c0_88 = arith.constant 0 : index
    %c0_89 = arith.constant 0 : index
    %133 = vector.load %arg2[%c7_87, %c0_88, %c0_89] : memref<9x1x256xf32, #tpu.memory_space<vmem>>, vector<1x1x256xf32>
    %134 = vector.shape_cast %133 : vector<1x1x256xf32> to vector<1x256xf32>
    %135 = vector.broadcast %134 : vector<1x256xf32> to vector<32x256xf32>
    %136 = arith.mulf %132, %135 : vector<32x256xf32>
    %c239_i32_90 = arith.constant 239 : i32
    %137 = tpu.dynamic_rotate %101 by %c239_i32_90 dim 1 : vector<32x256xf32>, i32 -> vector<32x256xf32>
    %c8_91 = arith.constant 8 : index
    %c0_92 = arith.constant 0 : index
    %c0_93 = arith.constant 0 : index
    %138 = vector.load %arg2[%c8_91, %c0_92, %c0_93] : memref<9x1x256xf32, #tpu.memory_space<vmem>>, vector<1x1x256xf32>
    %139 = vector.shape_cast %138 : vector<1x1x256xf32> to vector<1x256xf32>
    %140 = vector.broadcast %139 : vector<1x256xf32> to vector<32x256xf32>
    %141 = arith.mulf %137, %140 : vector<32x256xf32>
    %142 = tpu.concatenate %106, %111, %116, %121, %101, %126, %131, %136, %141 in 0 : vector<32x256xf32>, vector<32x256xf32>, vector<32x256xf32>, vector<32x256xf32>, vector<32x256xf32>, vector<32x256xf32>, vector<32x256xf32>, vector<32x256xf32>, vector<32x256xf32> -> vector<288x256xf32>
    %c0_94 = arith.constant 0 : index
    %c0_95 = arith.constant 0 : index
    %143 = vector.load %arg7[%c0_94, %c0_95] : memref<8x288xbf16, #tpu.memory_space<vmem>>, vector<8x288xbf16>
    %144 = arith.truncf %142 : vector<288x256xf32> to vector<288x256xbf16>
    %cst_96 = arith.constant dense<0.000000e+00> : vector<8x256xf32>
    %145 = tpu.matmul %143, %144, %cst_96 {dimension_numbers = #tpu.dot_dimension_numbers<[1], [0], [0], [1], [0, 0, 1, 1], [], []>} : vector<8x288xbf16>, vector<288x256xbf16>, vector<8x256xf32> -> vector<8x256xf32>
    %c0_97 = arith.constant 0 : index
    %c0_98 = arith.constant 0 : index
    %146 = vector.load %arg8[%c0_97, %c0_98] : memref<8x1xf32, #tpu.memory_space<vmem>>, vector<8x1xf32>
    %147 = vector.broadcast %146 : vector<8x1xf32> to vector<8x256xf32>
    %148 = arith.addf %145, %147 : vector<8x256xf32>
    %cst_99 = arith.constant 2.000000e-01 : f32
    %149 = vector.broadcast %cst_99 : f32 to vector<8x256xf32>
    %150 = arith.mulf %148, %149 : vector<8x256xf32>
    %151 = arith.maximumf %150, %148 : vector<8x256xf32>
    %c0_100 = arith.constant 0 : index
    %c0_101 = arith.constant 0 : index
    %c0_102 = arith.constant 0 : index
    %152 = vector.load %arg9[%c0_100, %c0_101, %c0_102] : memref<1x8x256xf32, #tpu.memory_space<vmem>>, vector<1x8x256xf32>
    %153 = vector.shape_cast %152 : vector<1x8x256xf32> to vector<8x256xf32>
    %154 = vector.shape_cast %151 : vector<8x256xf32> to vector<1x8x256xf32>
    tpu.vector_store %arg9[%c0_100, %c0_101, %c0_102], %154 {strides = array<i32>} : memref<1x8x256xf32, #tpu.memory_space<vmem>>, vector<1x8x256xf32>,
    return
  }
  func.func @transform_0(%arg0: i32) -> (i32, i32, i32) {
    %c0_i32 = arith.constant 0 : i32
    %c0_i32_0 = arith.constant 0 : i32
    %c0_i32_1 = arith.constant 0 : i32
    return %arg0, %c0_i32, %c0_i32_0 : i32, i32, i32
  }
  func.func @transform_1(%arg0: i32) -> (i32, i32, i32) {
    %c0_i32 = arith.constant 0 : i32
    %c0_i32_0 = arith.constant 0 : i32
    %c0_i32_1 = arith.constant 0 : i32
    %c0_i32_2 = arith.constant 0 : i32
    return %c0_i32, %c0_i32_0, %c0_i32_1 : i32, i32, i32
  }
  func.func @transform_2(%arg0: i32) -> (i32, i32) {
    %c0_i32 = arith.constant 0 : i32
    %c0_i32_0 = arith.constant 0 : i32
    %c0_i32_1 = arith.constant 0 : i32
    return %c0_i32, %c0_i32_0 : i32, i32
  }
  func.func @transform_3(%arg0: i32) -> (i32, i32) {
    %c0_i32 = arith.constant 0 : i32
    %c0_i32_0 = arith.constant 0 : i32
    %c0_i32_1 = arith.constant 0 : i32
    return %c0_i32, %c0_i32_0 : i32, i32
  }
  func.func @transform_4(%arg0: i32) -> (i32, i32) {
    %c0_i32 = arith.constant 0 : i32
    %c0_i32_0 = arith.constant 0 : i32
    %c0_i32_1 = arith.constant 0 : i32
    return %c0_i32, %c0_i32_0 : i32, i32
  }
  func.func @transform_5(%arg0: i32) -> (i32, i32) {
    %c0_i32 = arith.constant 0 : i32
    %c0_i32_0 = arith.constant 0 : i32
    %c0_i32_1 = arith.constant 0 : i32
    return %c0_i32, %c0_i32_0 : i32, i32
  }
  func.func @transform_6(%arg0: i32) -> (i32, i32) {
    %c0_i32 = arith.constant 0 : i32
    %c0_i32_0 = arith.constant 0 : i32
    %c0_i32_1 = arith.constant 0 : i32
    return %c0_i32, %c0_i32_0 : i32, i32
  }
  func.func @transform_7(%arg0: i32) -> (i32, i32) {
    %c0_i32 = arith.constant 0 : i32
    %c0_i32_0 = arith.constant 0 : i32
    %c0_i32_1 = arith.constant 0 : i32
    return %c0_i32, %c0_i32_0 : i32, i32
  }
  func.func @transform_8(%arg0: i32) -> (i32, i32, i32) {
    %c0_i32 = arith.constant 0 : i32
    %c0_i32_0 = arith.constant 0 : i32
    %c0_i32_1 = arith.constant 0 : i32
    return %arg0, %c0_i32, %c0_i32_0 : i32, i32, i32
  }
}

</mosaic_0001>

<bundles_post_ra>
// kernel: encoder_forward.1
= control target key start
LH: loop header
LB: loop body
LE: loop exit
PB: predicated region body
PF: predicated region fallthrough
CT: control target
= control target key end

     0   :  { %s1393_s27 = smov 0   ;;  %s2357_s0 = inlined_call_operand.vmem [shape: f32[2,8,256], index: 0, kind: input, shape index: {}]   ;;  %s2358_s1 = inlined_call_operand.vmem [shape: f32[9,1,256], index: 1, kind: input, shape index: {}]   ;;  %s2359_s2 = inlined_call_operand.vmem [shape: bf16[16,72], index: 2, kind: input, shape index: {}]   ;;  %s2360_s3 = inlined_call_operand.vmem [shape: f32[16,1], index: 3, kind: input, shape index: {}]   ;;  %s2361_s4 = inlined_call_operand.vmem [shape: bf16[32,144], index: 4, kind: input, shape index: {}]   ;;  %s2362_s5 = inlined_call_operand.vmem [shape: f32[32,1], index: 5, kind: input, shape index: {}]   ;;  %s2363_s6 = inlined_call_operand.vmem [shape: bf16[8,288], index: 6, kind: input, shape index: {}]   ;;  %s2364_s7 = inlined_call_operand.vmem [shape: f32[8,1], index: 7, kind: input, shape index: {}]   ;;  %s2365_s8 = inlined_call_operand.vmem [shape: f32[2,8,256], index: 8, kind: output, shape index: {}]  }
   0x1 LB: > { %s1258_s28 = sadd.s32 4294967295, %s1337_s27   ;;  %p1262_p0 = scmp.ge.s32.totalorder %s1337_s27, 1  ;;  %s1337_s27 = sphi %s1393_s27, %s18_s27  }
   0x2   : > { %p262_p1 = scmp.lt.s32.totalorder %s1337_s27, 3 }
   0x4   : > { %p263_p2 = pnand %p1262_p0, %p262_p1 }
   0x6   : > { %266 = sbr.rel (%p263_p2) target bundleno = 1101 (0x44d), region = 52 }
   0xb   : > { %p296_p3 = scmp.lt.s32.totalorder %s1258_s28, 1  ;;  %s1339_s11 = smov 113   ;;  %v313_v3 = vlaneseq  ;;  %v1273_v8 = vld [vmem:[%s2358_s1 + $0x10] sm:$0x3]  ;;  %v1272_v9 = vld [vmem:[%s2358_s1 + $0xe] sm:$0x3] }
   0xc   : > { %s1340_s12 = smov 111   ;;  %s1341_s13 = smov 112   ;;  %v1271_v10 = vld [vmem:[%s2358_s1 + $0xc] sm:$0x3]  ;;  %v1459_v11 = vperm.slane %v1273_v8, 0  ;;  %v1461_v12 = vperm.slane %v1273_v8, 1 }
   0xd   : > { %s2441_s28 = smov (!%p296_p3, %s1258_s28), 1  ;;  %s1342_s14 = smov 127   ;;  %v1445_v6 = vand.u32 127, %v313_v3  ;;  %v1463_v13 = vperm.slane %v1272_v9, 0  ;;  %v1465_v14 = vperm.slane %v1272_v9, 1  ;;  %v1467_v15 = vperm.slane %v1271_v10, 0 }
   0xe   : > { %s1304_s29 = sshll.u32 %s2441_s28, 4  ;;  %s1343_s15 = smov 15   ;;  %2389 = vst [vmem:[#allocation2_spill] sm:$0xff] %v1459_v11  ;;  %v1469_v16 = vperm.slane %v1271_v10, 1  ;;  %vm471_vm3 = vcmask 1043456   ;;  %v450_v45 = vld [vmem:[%s2360_s3] sm:$0xff] }
   0xf   : > { %s300_s10 = scalar_lea.vmem %s2357_s0, %s1304_s29  ;;  %s1344_s16 = smov 1   ;;  %vm410_vm0 = vcmp.lt.s32.totalorder %v1445_v6, 112  ;;  %vm394_vm1 = vcmp.lt.s32.totalorder %v1445_v6, 113  ;;  %vm426_vm2 = vcmp.lt.s32.totalorder %v1445_v6, 111  ;;  %2390 = vst [vmem:[#allocation3_spill] sm:$0xff] %v1461_v12  ;;  %vm378_vm4 = vcmp.lt.s32.totalorder %v1445_v6, 127 }
  0x10   : > { %v1409_v0 = vld [vmem:[%s300_s10] sm:$0xff]  ;;  %v1417_v1 = vld [vmem:[%s300_s10 + $0x8] sm:$0xff]  ;;  %s1345_s17 = smov 17   ;;  %s1346_s18 = smov 16   ;;  %v1347_v50 = vmov 0   ;;  %vm362_vm5 = vcmp.lt.s32.totalorder %v1445_v6, 1 }
  0x11   : > { %390 = vrot.lane.b32.xlu1 %v1409_v0, %s1339_s11  ;;  %422 = vrot.lane.b32.xlu0 %v1409_v0, %s1340_s12  ;;  %v1270_v27 = vld [vmem:[%s2358_s1 + $0xa] sm:$0x3]  ;;  %v1269_v49 = vld [vmem:[%s2358_s1 + $0x6] sm:$0x3]  ;;  %vm346_vm6 = vcmp.lt.s32.totalorder %v1445_v6, 15  ;;  %vm315_vm7 = vcmp.lt.s32.totalorder %v1445_v6, 17  ;;  %s305_s21 = scalar_lea.vmem %s2365_s8, %s1304_s29 }
  0x12   : > { %406 = vrot.lane.b32.xlu2 %v1409_v0, %s1341_s13  ;;  %v1493_v37 = vperm.slane %v1270_v27, 0  ;;  %v1495_v38 = vperm.slane %v1270_v27, 1  ;;  %v451_v46 = vld [vmem:[%s2360_s3 + $0x8] sm:$0xff]  ;;  %1328 = vset.pattern.permute.xlu1 %v1347_v50  ;;  %v1268_v51 = vld [vmem:[%s2358_s1 + $0x4] sm:$0x3]  ;;  %v1518_v54 = vperm.slane %v1269_v49, 0 }
  0x13   : > { %1329 = vset.pattern.permute.xlu2 %v1347_v50  ;;  %1330 = vset.pattern.permute.xlu0 %v1347_v50  ;;  %v1520_v56 = vperm.slane %v1269_v49, 1  ;;  %v1523_v57 = vperm.slane %v1268_v51, 0  ;;  %v1525_v58 = vperm.slane %v1268_v51, 1  ;;  %v318_v9 = vld [vmem:[%s2358_s1] sm:$0x3]  ;;  %vm330_vm8 = vcmp.lt.s32.totalorder %v1445_v6, 16 }
  0x14   : > { %v1267_v10 = vld [vmem:[%s2358_s1 + $0x2] sm:$0x3]  ;;  %vm467_vm9 = vcmask 588800   ;;  %vm706_vm10 = vcmask 130048   ;;  %vm1115_vm11 = vcmask 261120  }
  0x19   : > { %392 = vrot.lane.b32.xlu1 %v1417_v1, %s1339_s11  ;;  %424 = vrot.lane.b32.xlu0 %v1417_v1, %s1340_s12 }
  0x1a   : > { %408 = vrot.lane.b32.xlu2 %v1417_v1, %s1341_s13 }
  0x21   : > { %376 = vrot.lane.b32.xlu1 %v1417_v1, %s1342_s14  ;;  %374 = vrot.lane.b32.xlu0 %v1409_v0, %s1342_s14 }
  0x22   : > { %342 = vrot.lane.b32.xlu2 %v1409_v0, %s1343_s15 }
  0x29   : > { %358 = vrot.lane.b32.xlu1 %v1409_v0, %s1344_s16  ;;  %344 = vrot.lane.b32.xlu0 %v1417_v1, %s1343_s15 }
  0x2a   : > { %360 = vrot.lane.b32.xlu2 %v1417_v1, %s1344_s16 }
  0x31   : > { %311 = vrot.lane.b32.xlu1 %v1417_v1, %s1345_s17  ;;  %309 = vrot.lane.b32.xlu0 %v1409_v0, %s1345_s17 }
  0x32   : > { %326 = vrot.lane.b32.xlu2 %v1409_v0, %s1346_s18 }
  0x39   : > { %328 = vrot.lane.b32.xlu0 %v1417_v1, %s1346_s18  ;;  %454 = vperm.xlu1 %1328, %v450_v45  }
  0x3a   : > { %459 = vperm.xlu2 %1329, %v451_v46  }
  0x6c   : > { %v407_v2 = vpop.permute.xlu2 %406 }
  0x74   : > { %v409_v7 = vpop.permute.xlu2 %408 }
  0x75   : > { %v411_v19 = vsel %vm410_vm0, %v407_v2, %v409_v7  ;;  %v412_v23 = vsel %vm410_vm0, %v409_v7, %v407_v2 }
  0x76   : > { %v420_v28 = vmul.f32 %v1463_v13, %v411_v19  ;;  %v421_v33 = vmul.f32 %v1465_v14, %v412_v23  ;;  %v1548_v19 = vperm.slane %v318_v9, 1 }
  0x78   : > { %2392 = vst [vmem:[#allocation5_spill] sm:$0xff] %v1548_v19 }
  0x7c   : > { %v343_v32 = vpop.permute.xlu2 %342 }
  0x83   : > { %v391_v4 = vpop.permute.xlu1 %390  ;;  %v423_v5 = vpop.permute.xlu0 %422 }
  0x84   : > { %v361_v55 = vpop.permute.xlu2 %360 }
  0x8b   : > { %v393_v17 = vpop.permute.xlu1 %392  ;;  %v425_v18 = vpop.permute.xlu0 %424 }
  0x8c   : > { %v395_v20 = vsel %vm394_vm1, %v391_v4, %v393_v17  ;;  %v427_v21 = vsel %vm426_vm2, %v423_v5, %v425_v18  ;;  %v428_v22 = vsel %vm426_vm2, %v425_v18, %v423_v5  ;;  %v396_v24 = vsel %vm394_vm1, %v393_v17, %v391_v4 }
  0x8d   : > { %v436_v25 = vmul.f32 %v1459_v11, %v427_v21  ;;  %v437_v26 = vmul.f32 %v1461_v12, %v428_v22  ;;  %v404_v29 = vmul.f32 %v1467_v15, %v395_v20  ;;  %v405_v34 = vmul.f32 %v1469_v16, %v396_v24  ;;  %v327_v20 = vpop.permute.xlu2 %326 }
  0x8e   : > { %v1546_v18 = vperm.slane %v318_v9, 0  ;;  %v1551_v21 = vperm.slane %v1267_v10, 0  ;;  %v1553_v22 = vperm.slane %v1267_v10, 1 }
  0x8f   : > { %v448_v30 = vpack.c.bf16 %v436_v25, %v436_v25  ;;  %v449_v31 = vpack.c.bf16 %v437_v26, %v437_v26  ;;  %v446_v41 = vpack.c.bf16 %v420_v28, %v404_v29  ;;  %v447_v44 = vpack.c.bf16 %v421_v33, %v405_v34  ;;  %v1306_v34 = vld [vmem:[%s2359_s2] sm:$0xff] }
  0x90   : > { %2391 = vst [vmem:[#allocation4_spill] sm:$0xff] %v1546_v18 }
  0x91   : > { %v473_v35 = vsel %vm471_vm3, %v448_v30, 0  ;;  %v476_v36 = vsel %vm471_vm3, %v449_v31, 0 }
  0x92   : > { %481 = vmatpush.bf16.msra.mxu0 %v473_v35  ;;  %495 = vmatpush.bf16.msra.mxu1 %v476_v36 }
  0x93   : > { %v377_v39 = vpop.permute.xlu1 %376  ;;  %v375_v40 = vpop.permute.xlu0 %374 }
  0x94   : > { %v379_v42 = vsel %vm378_vm4, %v375_v40, %v377_v39  ;;  %v380_v43 = vsel %vm378_vm4, %v377_v39, %v375_v40 }
  0x95   : > { %v388_v47 = vmul.f32 %v1493_v37, %v379_v42  ;;  %v389_v48 = vmul.f32 %v1495_v38, %v380_v43  ;;  %v460_v46 = vpop.permute.xlu2 %459 }
  0x96   : > { %482 = vmatpush.bf16.msra.mxu0 %v446_v41  ;;  %496 = vmatpush.bf16.msra.mxu1 %v447_v44 }
  0x97   : > { %v444_v52 = vpack.c.bf16 %v388_v47, %v1409_v0  ;;  %v445_v53 = vpack.c.bf16 %v389_v48, %v1417_v1 }
  0x9a   : > { %483 = vmatpush.bf16.msra.mxu0 %v444_v52  ;;  %497 = vmatpush.bf16.msra.mxu1 %v445_v53 }
  0x9b   : > { %v359_v59 = vpop.permute.xlu1 %358  ;;  %v345_v60 = vpop.permute.xlu0 %344 }
  0x9c   : > { %v363_v61 = vsel %vm362_vm5, %v359_v59, %v361_v55  ;;  %v364_v62 = vsel %vm362_vm5, %v361_v55, %v359_v59  ;;  %v347_v63 = vsel %vm346_vm6, %v343_v32, %v345_v60  ;;  %v348_v0 = vsel %vm346_vm6, %v345_v60, %v343_v32  ;;  %v666_v59 = vld [vmem:[%s2362_s5 + $0x10] sm:$0xff]  ;;  %v664_v60 = vld [vmem:[%s2362_s5] sm:$0xff] }
  0x9d   : > { %v372_v1 = vmul.f32 %v1518_v54, %v364_v62  ;;  %v373_v2 = vmul.f32 %v1520_v56, %v363_v61  ;;  %v356_v3 = vmul.f32 %v1523_v57, %v348_v0  ;;  %v357_v4 = vmul.f32 %v1525_v58, %v347_v63  ;;  %v665_v61 = vld [vmem:[%s2362_s5 + $0x8] sm:$0xff] }
  0x9f   : > { %v442_v5 = vpack.c.bf16 %v372_v1, %v356_v3  ;;  %v443_v7 = vpack.c.bf16 %v373_v2, %v357_v4 }
  0xa1   : > { %484 = vmatpush.bf16.msra.mxu0 %v442_v5  ;;  %498 = vmatpush.bf16.msra.mxu1 %v443_v7 }
  0xa3   : > { %v310_v8 = vpop.permute.xlu0 %309  ;;  %v312_v17 = vpop.permute.xlu1 %311 }
  0xa4   : > { %v316_v23 = vsel %vm315_vm7, %v310_v8, %v312_v17  ;;  %v317_v24 = vsel %vm315_vm7, %v312_v17, %v310_v8 }
  0xa5   : > { %v324_v28 = vmul.f32 %v1546_v18, %v317_v24  ;;  %v325_v29 = vmul.f32 %v1548_v19, %v316_v23 }
  0xab   : > { %v329_v25 = vpop.permute.xlu0 %328  ;;  %v455_v35 = vpop.permute.xlu1 %454 }
  0xac   : > { %v331_v26 = vsel %vm330_vm8, %v327_v20, %v329_v25  ;;  %v332_v27 = vsel %vm330_vm8, %v329_v25, %v327_v20 }
  0xad   : > { %v340_v30 = vmul.f32 %v1551_v21, %v332_v27  ;;  %v341_v31 = vmul.f32 %v1553_v22, %v331_v26 }
  0xaf   : > { %v440_v32 = vpack.c.bf16 %v340_v30, %v324_v28  ;;  %v441_v33 = vpack.c.bf16 %v341_v31, %v325_v29 }
  0xb1   : > { %485 = vmatpush.bf16.msra.mxu0 %v440_v32  ;;  %499 = vmatpush.bf16.msra.mxu1 %v441_v33 }
  0xb4   : > { %1278 = vmatmul.msk.bf16.vlgmr.msra.gmra.mxu0 %vm467_vm9, %v1306_v34  ;;  %1279 = vmatmul.msk.bf16.vlgmr.msra.gmra.mxu1 %vm467_vm9, %v1306_v34 }
 0x131   : > { %v487_v36 = vpop.f32.mrf.mxu0  ;;  %v501_v39 = vpop.f32.mrf.mxu1 }
 0x132   : > { %v488_v40 = vadd.f32 %v487_v36, %v455_v35  ;;  %v502_v41 = vadd.f32 %v501_v39, %v455_v35  ;;  %v1307_v35 = vld [vmem:[%s2361_s4 + $0x4] sm:$0xf]  ;;  %v1284_v36 = vld [vmem:[%s2361_s4 + $0x8] sm:$0xf0] }
 0x134   : > { %v506_v42 = vmul.f32 0.2, %v488_v40  ;;  %v507_v43 = vmul.f32 0.2, %v502_v41 }
 0x136   : > { %v1570_v44 = vmax.f32 %v506_v42, %v488_v40  ;;  %v1572_v45 = vmax.f32 %v507_v43, %v502_v41  ;;  %v1287_v42 = vor.u32 %v1307_v35, %v1284_v36 }
 0x138   : > { %610 = vrot.lane.b32.xlu1 %v1570_v44, %s1341_s13  ;;  %626 = vrot.lane.b32.xlu0 %v1570_v44, %s1340_s12 }
 0x139   : > { %630 = vrot.lane.b32.xlu2 %v1572_v45, %s1340_s12  ;;  %v489_v47 = vpop.f32.mrf.mxu0  ;;  %v503_v48 = vpop.f32.mrf.mxu1 }
 0x13a   : > { %v490_v49 = vadd.f32 %v489_v47, %v460_v46  ;;  %v504_v50 = vadd.f32 %v503_v48, %v460_v46 }
 0x13c   : > { %v508_v51 = vmul.f32 0.2, %v490_v49  ;;  %v509_v52 = vmul.f32 0.2, %v504_v50 }
 0x13e   : > { %v1604_v53 = vmax.f32 %v508_v51, %v490_v49  ;;  %v1606_v55 = vmax.f32 %v509_v52, %v504_v50 }
 0x140   : > { %598 = vrot.lane.b32.xlu1 %v1572_v45, %s1339_s11  ;;  %614 = vrot.lane.b32.xlu0 %v1572_v45, %s1341_s13 }
 0x141   : > { %594 = vrot.lane.b32.xlu2 %v1570_v44, %s1339_s11 }
 0x148   : > { %562 = vrot.lane.b32.xlu1 %v1570_v44, %s1344_s16  ;;  %578 = vrot.lane.b32.xlu0 %v1570_v44, %s1342_s14 }
 0x149   : > { %582 = vrot.lane.b32.xlu2 %v1572_v45, %s1342_s14 }
 0x150   : > { %550 = vrot.lane.b32.xlu1 %v1572_v45, %s1343_s15  ;;  %566 = vrot.lane.b32.xlu0 %v1572_v45, %s1344_s16 }
 0x151   : > { %546 = vrot.lane.b32.xlu2 %v1570_v44, %s1343_s15 }
 0x158   : > { %514 = vrot.lane.b32.xlu1 %v1570_v44, %s1345_s17  ;;  %530 = vrot.lane.b32.xlu0 %v1570_v44, %s1346_s18 }
 0x159   : > { %534 = vrot.lane.b32.xlu2 %v1572_v45, %s1346_s18 }
 0x160   : > { %628 = vrot.lane.b32.xlu1 %v1604_v53, %s1340_s12  ;;  %632 = vrot.lane.b32.xlu0 %v1606_v55, %s1340_s12 }
 0x161   : > { %612 = vrot.lane.b32.xlu2 %v1604_v53, %s1341_s13 }
 0x168   : > { %616 = vrot.lane.b32.xlu1 %v1606_v55, %s1341_s13  ;;  %596 = vrot.lane.b32.xlu0 %v1604_v53, %s1339_s11 }
 0x169   : > { %600 = vrot.lane.b32.xlu2 %v1606_v55, %s1339_s11 }
 0x170   : > { %580 = vrot.lane.b32.xlu1 %v1604_v53, %s1342_s14  ;;  %584 = vrot.lane.b32.xlu0 %v1606_v55, %s1342_s14 }
 0x171   : > { %564 = vrot.lane.b32.xlu2 %v1604_v53, %s1344_s16 }
 0x178   : > { %568 = vrot.lane.b32.xlu1 %v1606_v55, %s1344_s16  ;;  %548 = vrot.lane.b32.xlu0 %v1604_v53, %s1343_s15 }
 0x179   : > { %552 = vrot.lane.b32.xlu2 %v1606_v55, %s1343_s15 }
 0x180   : > { %532 = vrot.lane.b32.xlu1 %v1604_v53, %s1346_s18  ;;  %536 = vrot.lane.b32.xlu0 %v1606_v55, %s1346_s18 }
 0x181   : > { %516 = vrot.lane.b32.xlu2 %v1604_v53, %s1345_s17 }
 0x188   : > { %520 = vrot.lane.b32.xlu1 %v1606_v55, %s1345_s17  ;;  %518 = vrot.lane.b32.xlu0 %v1572_v45, %s1345_s17 }
 0x189   : > { %680 = vperm.xlu2 %1329, %v666_v59  }
 0x190   : > { %670 = vperm.xlu1 %1328, %v664_v60  }
 0x191   : > { %675 = vperm.xlu2 %1329, %v665_v61  }
 0x193   : > { %v631_v62 = vpop.permute.xlu2 %630 }
 0x19b   : > { %v595_v63 = vpop.permute.xlu2 %594 }
 0x1a3   : > { %v583_v2 = vpop.permute.xlu2 %582 }
 0x1aa   : > { %v611_v0 = vpop.permute.xlu1 %610  ;;  %v627_v1 = vpop.permute.xlu0 %626 }
 0x1ab   : > { %v1651_v5 = vpop.permute.xlu2 %546  ;;  %v634_v25 = vsel %vm426_vm2, %v627_v1, %v631_v62  ;;  %v636_v26 = vsel %vm426_vm2, %v631_v62, %v627_v1 }
 0x1ac   : > { %v639_v31 = vmul.f32 %v636_v26, %v1461_v12  ;;  %v638_v33 = vmul.f32 %v634_v25, %v1459_v11 }
 0x1b2   : > { %v599_v3 = vpop.permute.xlu1 %598  ;;  %v615_v4 = vpop.permute.xlu0 %614 }
 0x1b3   : > { %v1655_v9 = vpop.permute.xlu2 %534  ;;  %v618_v43 = vsel %vm410_vm0, %v611_v0, %v615_v4  ;;  %v620_v46 = vsel %vm410_vm0, %v615_v4, %v611_v0  ;;  %v602_v0 = vsel %vm394_vm1, %v595_v63, %v599_v3  ;;  %v604_v1 = vsel %vm394_vm1, %v599_v3, %v595_v63 }
 0x1b4   : > { %v623_v59 = vmul.f32 %v620_v46, %v1465_v14  ;;  %v622_v61 = vmul.f32 %v618_v43, %v1463_v13 }
 0x1ba   : > { %v1653_v7 = vpop.permute.xlu1 %562  ;;  %v579_v8 = vpop.permute.xlu0 %578 }
 0x1bb   : > { %v613_v24 = vpop.permute.xlu2 %612 }
 0x1c2   : > { %v1657_v10 = vpop.permute.xlu1 %550  ;;  %v1659_v17 = vpop.permute.xlu0 %566 }
 0x1c3   : > { %v601_v39 = vpop.permute.xlu2 %600 }
 0x1ca   : > { %v1661_v20 = vpop.permute.xlu1 %514  ;;  %v1663_v23 = vpop.permute.xlu0 %530 }
 0x1d2   : > { %v629_v27 = vpop.permute.xlu1 %628  ;;  %v633_v28 = vpop.permute.xlu0 %632 }
 0x1d3   : > { %v635_v29 = vsel %vm426_vm2, %v629_v27, %v633_v28  ;;  %v637_v30 = vsel %vm426_vm2, %v633_v28, %v629_v27  ;;  %v565_v27 = vpop.permute.xlu2 %564  ;;  %v606_v28 = vmul.f32 %v602_v0, %v1467_v15  ;;  %v554_v0 = vsel %vm346_vm6, %v1651_v5, %v1657_v10 }
 0x1d4   : > { %v641_v32 = vmul.f32 %v637_v30, %v1461_v12  ;;  %v640_v34 = vmul.f32 %v635_v29, %v1459_v11  ;;  %v607_v29 = vmul.f32 %v604_v1, %v1469_v16  ;;  %v586_v30 = vsel %vm378_vm4, %v579_v8, %v583_v2 }
 0x1d6   : > { %v662_v40 = vpack.c.bf16 %v640_v34, %v638_v33  ;;  %v663_v41 = vpack.c.bf16 %v641_v32, %v639_v31  ;;  %v588_v31 = vsel %vm378_vm4, %v583_v2, %v579_v8  ;;  %v590_v34 = vmul.f32 %v586_v30, %v1493_v37  ;;  %v1309_v2 = vld [vmem:[%s2361_s4 + $0x14] sm:$0xf]  ;;  %v1292_v8 = vld [vmem:[%s2361_s4 + $0x18] sm:$0xf0] }
 0x1d7   : > { %v1295_v46 = vor.u32 %v1309_v2, %v1292_v8 }
 0x1d8   : > { %739 = vmatpush.bf16.msra.mxu3 %v662_v40  ;;  %777 = vmatpush.bf16.msrb.mxu0 %v663_v41 }
 0x1da   : > { %v617_v47 = vpop.permute.xlu1 %616  ;;  %v597_v48 = vpop.permute.xlu0 %596 }
 0x1db   : > { %v619_v49 = vsel %vm410_vm0, %v613_v24, %v617_v47  ;;  %v621_v50 = vsel %vm410_vm0, %v617_v47, %v613_v24  ;;  %v603_v51 = vsel %vm394_vm1, %v597_v48, %v601_v39  ;;  %v605_v52 = vsel %vm394_vm1, %v601_v39, %v597_v48  ;;  %1296 = vmatmul.msk.bf16.vlgmr.msra.gmra.mxu3 %vm706_vm10, %v1287_v42 }
 0x1dc   : > { %v625_v60 = vmul.f32 %v621_v50, %v1465_v14  ;;  %v624_v62 = vmul.f32 %v619_v49, %v1463_v13  ;;  %1298 = vmatmul.msk.bf16.vlgmr.msrb.gmra.mxu0 %vm706_vm10, %v1287_v42  ;;  %v608_v4 = vmul.f32 %v603_v51, %v1467_v15  ;;  %v609_v24 = vmul.f32 %v605_v52, %v1469_v16  ;;  %v553_v49 = vpop.permute.xlu2 %552 }
 0x1dd   : > { %v591_v39 = vmul.f32 %v588_v31, %v1495_v38  ;;  %v572_v47 = vsel %vm362_vm5, %v1659_v17, %v1653_v7  ;;  %v570_v48 = vsel %vm362_vm5, %v1653_v7, %v1659_v17  ;;  %v654_v52 = vpack.c.bf16 %v1604_v53, %v1570_v44 }
 0x1de   : > { %v660_v25 = vpack.c.bf16 %v624_v62, %v622_v61  ;;  %v661_v26 = vpack.c.bf16 %v625_v60, %v623_v59  ;;  %v658_v32 = vpack.c.bf16 %v608_v4, %v606_v28  ;;  %v659_v33 = vpack.c.bf16 %v609_v24, %v607_v29 }
 0x1df   : > { %v655_v59 = vpack.c.bf16 %v1606_v55, %v1572_v45  ;;  %v574_v60 = vmul.f32 %v572_v47, %v1518_v54  ;;  %v575_v17 = vmul.f32 %v570_v48, %v1520_v56  ;;  %v556_v55 = vsel %vm346_vm6, %v1657_v10, %v1651_v5 }
 0x1e0   : > { %713 = vmatpush.bf16.msra.mxu2 %v660_v25  ;;  %751 = vmatpush.bf16.msrb.mxu3 %v661_v26  ;;  %v558_v26 = vmul.f32 %v556_v55, %v1523_v57  ;;  %v559_v28 = vmul.f32 %v554_v0, %v1525_v58  ;;  %v538_v5 = vsel %vm330_vm8, %v1663_v23, %v1655_v9 }
 0x1e2   : > { %v581_v63 = vpop.permute.xlu1 %580  ;;  %v585_v3 = vpop.permute.xlu0 %584 }
 0x1e3   : > { %v587_v35 = vsel %vm378_vm4, %v581_v63, %v585_v3  ;;  %v589_v36 = vsel %vm378_vm4, %v585_v3, %v581_v63 }
 0x1e4   : > { %v592_v40 = vmul.f32 %v587_v35, %v1493_v37  ;;  %v593_v41 = vmul.f32 %v589_v36, %v1495_v38  ;;  %714 = vmatpush.bf16.msra.mxu2 %v658_v32  ;;  %752 = vmatpush.bf16.msrb.mxu3 %v659_v33  ;;  %v667_v33 = vld [vmem:[%s2362_s5 + $0x18] sm:$0xff] }
 0x1e5   : > { %685 = vperm.xlu0 %1330, %v667_v33  }
 0x1e6   : > { %v656_v42 = vpack.c.bf16 %v592_v40, %v590_v34  ;;  %v657_v43 = vpack.c.bf16 %v593_v41, %v591_v39  ;;  %v543_v34 = vmul.f32 %v538_v5, %v1553_v22  ;;  %v517_v39 = vpop.permute.xlu2 %516 }
 0x1e8   : > { %715 = vmatpush.bf16.msra.mxu2 %v656_v42  ;;  %753 = vmatpush.bf16.msrb.mxu3 %v657_v43 }
 0x1ea   : > { %v569_v50 = vpop.permute.xlu1 %568  ;;  %v549_v51 = vpop.permute.xlu0 %548 }
 0x1eb   : > { %v571_v61 = vsel %vm362_vm5, %v565_v27, %v569_v50  ;;  %v573_v62 = vsel %vm362_vm5, %v569_v50, %v565_v27  ;;  %v557_v7 = vsel %vm346_vm6, %v553_v49, %v549_v51  ;;  %1297 = vmatmul.msk.bf16.gmra.mxu3 %vm706_vm10, %v1295_v46  ;;  %v555_v45 = vsel %vm346_vm6, %v549_v51, %v553_v49  ;;  %v1282_v50 = vld [vmem:[%s2361_s4] sm:$0xf]  ;;  %v1308_v51 = vld [vmem:[%s2361_s4 + $0x4] sm:$0xf0] }
 0x1ec   : > { %v576_v44 = vmul.f32 %v573_v62, %v1518_v54  ;;  %v577_v53 = vmul.f32 %v571_v61, %v1520_v56  ;;  %716 = vmatpush.bf16.msra.mxu2 %v654_v52  ;;  %754 = vmatpush.bf16.msrb.mxu3 %v655_v59  ;;  %v560_v1 = vmul.f32 %v557_v7, %v1523_v57  ;;  %v1310_v61 = vld [vmem:[%s2361_s4 + $0x14] sm:$0xf0] }
 0x1ed   : > { %1299 = vmatmul.msk.bf16.gmra.mxu0 %vm706_vm10, %v1295_v46  ;;  %v561_v25 = vmul.f32 %v555_v45, %v1525_v58  ;;  %v540_v27 = vsel %vm330_vm8, %v1655_v9, %v1663_v23 }
 0x1ee   : > { %v652_v4 = vpack.c.bf16 %v576_v44, %v574_v60  ;;  %v653_v24 = vpack.c.bf16 %v577_v53, %v575_v17  ;;  %v650_v30 = vpack.c.bf16 %v560_v1, %v558_v26  ;;  %v542_v31 = vmul.f32 %v540_v27, %v1551_v21  ;;  %v681_v5 = vpop.permute.xlu2 %680 }
 0x1ef   : > { %v651_v32 = vpack.c.bf16 %v561_v25, %v559_v28  ;;  %v1283_v60 = vor.u32 %v1308_v51, %v1282_v50 }
 0x1f0   : > { %717 = vmatpush.bf16.msra.mxu2 %v652_v4  ;;  %755 = vmatpush.bf16.msrb.mxu3 %v653_v24 }
 0x1f2   : > { %v533_v10 = vpop.permute.xlu1 %532  ;;  %v537_v29 = vpop.permute.xlu0 %536 }
 0x1f3   : > { %v539_v63 = vsel %vm330_vm8, %v533_v10, %v537_v29  ;;  %v541_v3 = vsel %vm330_vm8, %v537_v29, %v533_v10 }
 0x1f4   : > { %v544_v9 = vmul.f32 %v541_v3, %v1551_v21  ;;  %v545_v23 = vmul.f32 %v539_v63, %v1553_v22  ;;  %718 = vmatpush.bf16.msra.mxu2 %v650_v30  ;;  %756 = vmatpush.bf16.msrb.mxu3 %v651_v32 }
 0x1f6   : > { %v648_v35 = vpack.c.bf16 %v544_v9, %v542_v31  ;;  %v649_v36 = vpack.c.bf16 %v545_v23, %v543_v34  ;;  %v676_v31 = vpop.permute.xlu2 %675 }
 0x1f8   : > { %719 = vmatpush.bf16.msra.mxu2 %v648_v35  ;;  %757 = vmatpush.bf16.msrb.mxu3 %v649_v36 }
 0x1fa   : > { %v521_v40 = vpop.permute.xlu1 %520  ;;  %v519_v41 = vpop.permute.xlu0 %518 }
 0x1fb   : > { %v523_v2 = vsel %vm315_vm7, %v517_v39, %v521_v40  ;;  %v525_v8 = vsel %vm315_vm7, %v521_v40, %v517_v39  ;;  %v522_v42 = vsel %vm315_vm7, %v1661_v20, %v519_v41  ;;  %v524_v43 = vsel %vm315_vm7, %v519_v41, %v1661_v20  ;;  %v1290_v20 = vld [vmem:[%s2361_s4 + $0x10] sm:$0xf] }
 0x1fc   : > { %v528_v46 = vmul.f32 %v525_v8, %v1546_v18  ;;  %v529_v47 = vmul.f32 %v523_v2, %v1548_v19  ;;  %v526_v48 = vmul.f32 %v524_v43, %v1546_v18  ;;  %v527_v49 = vmul.f32 %v522_v42, %v1548_v19 }
 0x1fd   : > { %v1291_v62 = vor.u32 %v1310_v61, %v1290_v20 }
 0x1fe   : > { %v646_v52 = vpack.c.bf16 %v528_v46, %v526_v48  ;;  %v647_v59 = vpack.c.bf16 %v529_v47, %v527_v49 }
 0x200   : > { %720 = vmatpush.bf16.msra.mxu2 %v646_v52  ;;  %758 = vmatpush.bf16.msrb.mxu3 %v647_v59 }
 0x202   : > { %v671_v45 = vpop.permute.xlu1 %670 }
 0x203   : > { %721 = vmatmul.bf16.vlgmr.msra.gmra.mxu2 %v1283_v60  ;;  %759 = vmatmul.bf16.vlgmr.msrb.gmra.mxu3 %v1283_v60 }
 0x213   : > { %726 = vmatmul.bf16.gmra.mxu2 %v1291_v62  ;;  %764 = vmatmul.bf16.gmra.mxu3 %v1291_v62 }
 0x257   : > { %v686_v49 = vpop.permute.xlu0 %685 }
 0x259   : > { %v779_v25 = vpop.f32.mrf.mxu0 }
 0x25e   : > { %v741_v7 = vpop.f32.mrf.mxu3 }
 0x261   : > { %v781_v23 = vpop.f32.mrf.mxu0 }
 0x266   : > { %v743_v17 = vpop.f32.mrf.mxu3 }
 0x26a   : > { %v784_v47 = vpop.f32.mrf.mxu0 }
 0x26e   : > { %v746_v44 = vpop.f32.mrf.mxu3 }
 0x276   : > { %v1810_v53 = vpop.f32.mrf.mxu3 }
 0x286   : > { %v722_v55 = vpop.f32.mrf.mxu2  ;;  %v760_v0 = vpop.f32.mrf.mxu3 }
 0x287   : > { %v723_v1 = vadd.f32 %v722_v55, %v671_v45  ;;  %v761_v24 = vadd.f32 %v760_v0, %v671_v45 }
 0x289   : > { %v742_v4 = vadd.f32 %v741_v7, %v723_v1  ;;  %v780_v28 = vadd.f32 %v779_v25, %v761_v24 }
 0x28b   : > { %v789_v26 = vmul.f32 0.2, %v742_v4  ;;  %v790_v10 = vmul.f32 0.2, %v780_v28 }
 0x28d   : > { %v1812_v27 = vmax.f32 %v789_v26, %v742_v4  ;;  %v1820_v29 = vmax.f32 %v790_v10, %v780_v28 }
 0x28e   : > { %v724_v30 = vpop.f32.mrf.mxu2  ;;  %v762_v34 = vpop.f32.mrf.mxu3 }
 0x28f   : > { %933 = vrot.lane.b32.xlu1 %v1812_v27, %s1342_s14  ;;  %965 = vrot.lane.b32.xlu0 %v1812_v27, %s1339_s11  ;;  %2393 = vst [vmem:[#allocation6_spill] sm:$0xff] %v1820_v29  ;;  %v725_v63 = vadd.f32 %v724_v30, %v676_v31  ;;  %v763_v9 = vadd.f32 %v762_v34, %v676_v31 }
 0x290   : > { %997 = vrot.lane.b32.xlu2 %v1812_v27, %s1341_s13 }
 0x291   : > { %v744_v3 = vadd.f32 %v743_v17, %v725_v63  ;;  %v782_v35 = vadd.f32 %v781_v23, %v763_v9 }
 0x293   : > { %v791_v32 = vmul.f32 0.2, %v744_v3  ;;  %v792_v39 = vmul.f32 0.2, %v782_v35 }
 0x295   : > { %v1834_v33 = vmax.f32 %v791_v32, %v744_v3  ;;  %v1854_v41 = vmax.f32 %v792_v39, %v782_v35 }
 0x296   : > { %v727_v36 = vpop.f32.mrf.mxu2  ;;  %v765_v43 = vpop.f32.mrf.mxu3 }
 0x297   : > { %869 = vrot.lane.b32.xlu0 %v1812_v27, %s1343_s15  ;;  %1005 = vrot.lane.b32.xlu1 %v1820_v29, %s1341_s13  ;;  %v728_v40 = vadd.f32 %v727_v36, %v681_v5  ;;  %2394 = vst [vmem:[#allocation7_spill] sm:$0xff] %v1854_v41  ;;  %v766_v46 = vadd.f32 %v765_v43, %v681_v5 }
 0x298   : > { %901 = vrot.lane.b32.xlu2 %v1812_v27, %s1344_s16 }
 0x299   : > { %v747_v2 = vadd.f32 %v746_v44, %v728_v40  ;;  %v785_v48 = vadd.f32 %v784_v47, %v766_v46  ;;  %v786_v44 = vpop.f32.mrf.mxu0 }
 0x29b   : > { %v793_v8 = vmul.f32 0.2, %v747_v2  ;;  %v794_v51 = vmul.f32 0.2, %v785_v48 }
 0x29d   : > { %v1862_v42 = vmax.f32 %v793_v8, %v747_v2  ;;  %v1882_v59 = vmax.f32 %v794_v51, %v785_v48 }
 0x29e   : > { %v729_v50 = vpop.f32.mrf.mxu2  ;;  %v767_v7 = vpop.f32.mrf.mxu3 }
 0x29f   : > { %837 = vrot.lane.b32.xlu0 %v1812_v27, %s1346_s18  ;;  %909 = vrot.lane.b32.xlu1 %v1820_v29, %s1344_s16  ;;  %v730_v52 = vadd.f32 %v729_v50, %v686_v49  ;;  %2395 = vst [vmem:[#allocation8_spill] sm:$0xff] %v1882_v59  ;;  %v768_v17 = vadd.f32 %v767_v7, %v686_v49 }
 0x2a0   : > { %973 = vrot.lane.b32.xlu2 %v1820_v29, %s1339_s11 }
 0x2a1   : > { %v749_v60 = vadd.f32 %v1810_v53, %v730_v52  ;;  %v787_v45 = vadd.f32 %v786_v44, %v768_v17 }
 0x2a3   : > { %v795_v20 = vmul.f32 0.2, %v749_v60  ;;  %v796_v55 = vmul.f32 0.2, %v787_v45 }
 0x2a5   : > { %v1891_v61 = vmax.f32 %v795_v20, %v749_v60  ;;  %v1911_v1 = vmax.f32 %v796_v55, %v787_v45 }
 0x2a7   : > { %941 = vrot.lane.b32.xlu0 %v1820_v29, %s1342_s14  ;;  %967 = vrot.lane.b32.xlu1 %v1834_v33, %s1339_s11  ;;  %2396 = vst [vmem:[#allocation9_spill] sm:$0xff] %v1911_v1 }
 0x2a8   : > { %877 = vrot.lane.b32.xlu2 %v1820_v29, %s1343_s15 }
 0x2af   : > { %999 = vrot.lane.b32.xlu0 %v1834_v33, %s1341_s13  ;;  %871 = vrot.lane.b32.xlu1 %v1834_v33, %s1343_s15 }
 0x2b0   : > { %845 = vrot.lane.b32.xlu2 %v1820_v29, %s1346_s18 }
 0x2b7   : > { %903 = vrot.lane.b32.xlu0 %v1834_v33, %s1344_s16  ;;  %839 = vrot.lane.b32.xlu1 %v1834_v33, %s1346_s18 }
 0x2b8   : > { %935 = vrot.lane.b32.xlu2 %v1834_v33, %s1342_s14 }
 0x2bf   : > { %975 = vrot.lane.b32.xlu0 %v1854_v41, %s1339_s11  ;;  %943 = vrot.lane.b32.xlu1 %v1854_v41, %s1342_s14 }
 0x2c0   : > { %1007 = vrot.lane.b32.xlu2 %v1854_v41, %s1341_s13 }
 0x2c7   : > { %879 = vrot.lane.b32.xlu0 %v1854_v41, %s1343_s15  ;;  %1001 = vrot.lane.b32.xlu1 %v1862_v42, %s1341_s13 }
 0x2c8   : > { %911 = vrot.lane.b32.xlu2 %v1854_v41, %s1344_s16 }
 0x2cf   : > { %847 = vrot.lane.b32.xlu0 %v1854_v41, %s1346_s18  ;;  %969 = vrot.lane.b32.xlu1 %v1862_v42, %s1339_s11 }
 0x2d0   : > { %937 = vrot.lane.b32.xlu2 %v1862_v42, %s1342_s14 }
 0x2d7   : > { %905 = vrot.lane.b32.xlu0 %v1862_v42, %s1344_s16  ;;  %873 = vrot.lane.b32.xlu1 %v1862_v42, %s1343_s15 }
 0x2d8   : > { %841 = vrot.lane.b32.xlu2 %v1862_v42, %s1346_s18 }
 0x2df   : > { %1009 = vrot.lane.b32.xlu0 %v1882_v59, %s1341_s13  ;;  %809 = vrot.lane.b32.xlu1 %v1862_v42, %s1345_s17 }
 0x2e0   : > { %913 = vrot.lane.b32.xlu2 %v1882_v59, %s1344_s16 }
 0x2e7   : > { %977 = vrot.lane.b32.xlu0 %v1882_v59, %s1339_s11  ;;  %945 = vrot.lane.b32.xlu1 %v1882_v59, %s1342_s14 }
 0x2e8   : > { %1003 = vrot.lane.b32.xlu2 %v1891_v61, %s1341_s13 }
 0x2ea   : > { %v998_v62 = vpop.permute.xlu2 %997 }
 0x2ef   : > { %881 = vrot.lane.b32.xlu0 %v1882_v59, %s1343_s15  ;;  %849 = vrot.lane.b32.xlu1 %v1882_v59, %s1346_s18 }
 0x2f0   : > { %971 = vrot.lane.b32.xlu2 %v1891_v61, %s1339_s11 }
 0x2f2   : > { %v902_v53 = vpop.permute.xlu2 %901 }
 0x2f7   : > { %939 = vrot.lane.b32.xlu0 %v1891_v61, %s1342_s14  ;;  %907 = vrot.lane.b32.xlu1 %v1891_v61, %s1344_s16 }
 0x2f8   : > { %875 = vrot.lane.b32.xlu2 %v1891_v61, %s1343_s15 }
 0x2fa   : > { %v974_v0 = vpop.permute.xlu2 %973 }
 0x2ff   : > { %843 = vrot.lane.b32.xlu0 %v1891_v61, %s1346_s18  ;;  %1011 = vrot.lane.b32.xlu1 %v1911_v1, %s1341_s13 }
 0x300   : > { %811 = vrot.lane.b32.xlu2 %v1891_v61, %s1345_s17 }
 0x301   : > { %v934_v4 = vpop.permute.xlu1 %933  ;;  %v966_v24 = vpop.permute.xlu0 %965 }
 0x302   : > { %v981_v25 = vsel %vm394_vm1, %v966_v24, %v974_v0  ;;  %v985_v26 = vsel %vm394_vm1, %v974_v0, %v966_v24  ;;  %v878_v28 = vpop.permute.xlu2 %877 }
 0x307   : > { %915 = vrot.lane.b32.xlu0 %v1911_v1, %s1344_s16  ;;  %813 = vrot.lane.b32.xlu1 %v1820_v29, %s1345_s17 }
 0x308   : > { %805 = vrot.lane.b32.xlu2 %v1812_v27, %s1345_s17 }
 0x309   : > { %v870_v5 = vpop.permute.xlu0 %869  ;;  %v1006_v10 = vpop.permute.xlu1 %1005 }
 0x30a   : > { %v1931_v30 = vsel %vm346_vm6, %v870_v5, %v878_v28  ;;  %v1935_v31 = vsel %vm346_vm6, %v878_v28, %v870_v5  ;;  %v846_v63 = vpop.permute.xlu2 %845  ;;  %v1013_v3 = vsel %vm410_vm0, %v998_v62, %v1006_v10  ;;  %v1017_v32 = vsel %vm410_vm0, %v1006_v10, %v998_v62 }
 0x30b   : > { %v1980_v60 = vmul.f32 %v1013_v3, %v1463_v13  ;;  %v1983_v20 = vmul.f32 %v1017_v32, %v1465_v14  ;;  %v2030_v32 = vmul.f32 %v981_v25, %v1467_v15 }
 0x30d   : > { %2397 = vst [vmem:[#allocation10_spill] sm:$0xff] %v1983_v20 }
 0x30f   : > { %817 = vrot.lane.b32.xlu0 %v1882_v59, %s1345_s17  ;;  %979 = vrot.lane.b32.xlu1 %v1911_v1, %s1339_s11 }
 0x310   : > { %947 = vrot.lane.b32.xlu2 %v1911_v1, %s1342_s14 }
 0x311   : > { %v838_v34 = vpop.permute.xlu0 %837  ;;  %v910_v9 = vpop.permute.xlu1 %909 }
 0x312   : > { %v1949_v23 = vsel %vm330_vm8, %v838_v34, %v846_v63  ;;  %v1953_v35 = vsel %vm330_vm8, %v846_v63, %v838_v34  ;;  %v936_v36 = vpop.permute.xlu2 %935  ;;  %v917_v39 = vsel %vm362_vm5, %v902_v53, %v910_v9  ;;  %v921_v40 = vsel %vm362_vm5, %v910_v9, %v902_v53 }
 0x313   : > { %v2008_v24 = vmul.f32 %v921_v40, %v1518_v54  ;;  %v2011_v28 = vmul.f32 %v917_v39, %v1520_v56  ;;  %v2033_v34 = vmul.f32 %v985_v26, %v1469_v16 }
 0x315   : > { %2399 = vst [vmem:[#allocation12_spill] sm:$0xff] %v2033_v34 }
 0x317   : > { %807 = vrot.lane.b32.xlu0 %v1834_v33, %s1345_s17  ;;  %883 = vrot.lane.b32.xlu1 %v1911_v1, %s1343_s15 }
 0x318   : > { %851 = vrot.lane.b32.xlu2 %v1911_v1, %s1346_s18 }
 0x319   : > { %v942_v2 = vpop.permute.xlu0 %941  ;;  %v968_v8 = vpop.permute.xlu1 %967 }
 0x31a   : > { %v949_v43 = vsel %vm378_vm4, %v934_v4, %v942_v2  ;;  %v953_v46 = vsel %vm378_vm4, %v942_v2, %v934_v4  ;;  %v1008_v47 = vpop.permute.xlu2 %1007 }
 0x31b   : > { %v2036_v9 = vmul.f32 %v949_v43, %v1493_v37  ;;  %v2039_v39 = vmul.f32 %v953_v46, %v1495_v38 }
 0x31d   : > { %2400 = vst [vmem:[#allocation13_spill] sm:$0xff] %v2039_v39 }
 0x31f   : > { %1033 = vrot.lane.b32.xlu0 %v1862_v42, %s1340_s12  ;;  %1035 = vrot.lane.b32.xlu1 %v1891_v61, %s1340_s12 }
 0x320   : > { %815 = vrot.lane.b32.xlu2 %v1854_v41, %s1345_s17 }
 0x321   : > { %v1000_v48 = vpop.permute.xlu0 %999  ;;  %v872_v49 = vpop.permute.xlu1 %871 }
 0x322   : > { %v1014_v50 = vsel %vm410_vm0, %v1000_v48, %v1008_v47  ;;  %v1018_v51 = vsel %vm410_vm0, %v1008_v47, %v1000_v48  ;;  %v912_v52 = vpop.permute.xlu2 %911 }
 0x323   : > { %v1986_v62 = vmul.f32 %v1014_v50, %v1463_v13  ;;  %v1989_v7 = vmul.f32 %v1018_v51, %v1465_v14 }
 0x325   : > { %2398 = vst [vmem:[#allocation11_spill] sm:$0xff] %v1989_v7 }
 0x327   : > { %1043 = vrot.lane.b32.xlu0 %v1911_v1, %s1340_s12  ;;  %819 = vrot.lane.b32.xlu1 %v1911_v1, %s1345_s17 }
 0x328   : > { %1041 = vrot.lane.b32.xlu2 %v1882_v59, %s1340_s12 }
 0x329   : > { %v904_v53 = vpop.permute.xlu0 %903  ;;  %v840_v45 = vpop.permute.xlu1 %839 }
 0x32a   : > { %v918_v55 = vsel %vm362_vm5, %v904_v53, %v912_v52  ;;  %v922_v0 = vsel %vm362_vm5, %v912_v52, %v904_v53  ;;  %v2005_v4 = vpop.permute.xlu2 %937 }
 0x32b   : > { %v2014_v5 = vmul.f32 %v922_v0, %v1518_v54  ;;  %v2017_v10 = vmul.f32 %v918_v55, %v1520_v56  ;;  %v2086_v0 = vmul.f32 %v1931_v30, %v1525_v58 }
 0x32f   : > { %1037 = vrot.lane.b32.xlu0 %v1820_v29, %s1340_s12  ;;  %1029 = vrot.lane.b32.xlu1 %v1812_v27, %s1340_s12 }
 0x330   : > { %1031 = vrot.lane.b32.xlu2 %v1834_v33, %s1340_s12 }
 0x331   : > { %v976_v40 = vpop.permute.xlu0 %975  ;;  %v944_v2 = vpop.permute.xlu1 %943 }
 0x332   : > { %v982_v47 = vsel %vm394_vm1, %v968_v8, %v976_v40  ;;  %v986_v48 = vsel %vm394_vm1, %v976_v40, %v968_v8  ;;  %v2045_v50 = vpop.permute.xlu2 %841  ;;  %v950_v25 = vsel %vm378_vm4, %v936_v36, %v944_v2  ;;  %v954_v26 = vsel %vm378_vm4, %v944_v2, %v936_v36  ;;  %v1099_v8 = vld [vmem:[%s2364_s7] sm:$0xff] }
 0x333   : > { %v2052_v43 = vmul.f32 %v982_v47, %v1467_v15  ;;  %v2055_v46 = vmul.f32 %v986_v48, %v1469_v16  ;;  %v2058_v51 = vmul.f32 %v950_v25, %v1493_v37  ;;  %v2061_v52 = vmul.f32 %v954_v26, %v1495_v38 }
 0x334   : > { %v2082_v26 = vmul.f32 %v1935_v31, %v1523_v57 }
 0x335   : > { %2401 = vst [vmem:[#allocation14_spill] sm:$0xff] %v2055_v46 }
 0x336   : > { %2402 = vst [vmem:[#allocation15_spill] sm:$0xff] %v2061_v52 }
 0x337   : > { %1039 = vrot.lane.b32.xlu1 %v1854_v41, %s1340_s12 }
 0x338   : > { %1102 = vperm.xlu2 %1329, %v1099_v8  }
 0x339   : > { %v880_v40 = vpop.permute.xlu0 %879  ;;  %v1002_v2 = vpop.permute.xlu1 %1001 }
 0x33a   : > { %v886_v47 = vsel %vm346_vm6, %v872_v49, %v880_v40  ;;  %v890_v48 = vsel %vm346_vm6, %v880_v40, %v872_v49  ;;  %v914_v25 = vpop.permute.xlu2 %913 }
 0x33b   : > { %v2089_v55 = vmul.f32 %v890_v48, %v1523_v57  ;;  %v2092_v8 = vmul.f32 %v886_v47, %v1525_v58  ;;  %v2104_v48 = vmul.f32 %v1953_v35, %v1551_v21  ;;  %v2108_v47 = vmul.f32 %v1949_v23, %v1553_v22 }
 0x33c   : > { %v2429_v6 = vld [vmem:[#allocation14_spill] sm:$0xff] }
 0x33d   : > { %2403 = vst [vmem:[#allocation16_spill] sm:$0xff] %v2104_v48 }
 0x33e   : > { %2404 = vst [vmem:[#allocation17_spill] sm:$0xff] %v2108_v47 }
 0x341   : > { %v848_v40 = vpop.permute.xlu0 %847  ;;  %v970_v36 = vpop.permute.xlu1 %969 }
 0x342   : > { %v854_v31 = vsel %vm330_vm8, %v840_v45, %v848_v40  ;;  %v858_v30 = vsel %vm330_vm8, %v848_v40, %v840_v45  ;;  %v1004_v53 = vpop.permute.xlu2 %1003 }
 0x343   : > { %v2111_v44 = vmul.f32 %v858_v30, %v1551_v21  ;;  %v2114_v49 = vmul.f32 %v854_v31, %v1553_v22 }
 0x345   : > { %2405 = vst [vmem:[#allocation18_spill] sm:$0xff] %v2111_v44 }
 0x346   : > { %2406 = vst [vmem:[#allocation19_spill] sm:$0xff] %v2114_v49 }
 0x349   : > { %v906_v40 = vpop.permute.xlu0 %905  ;;  %v2120_v63 = vpop.permute.xlu1 %873 }
 0x34a   : > { %v972_v35 = vpop.permute.xlu2 %971  ;;  %v919_v48 = vsel %vm362_vm5, %v906_v40, %v914_v25 }
 0x351   : > { %v1010_v17 = vpop.permute.xlu0 %1009  ;;  %v2122_v41 = vpop.permute.xlu1 %809 }
 0x352   : > { %v1019_v23 = vsel %vm410_vm0, %v1010_v17, %v1002_v2  ;;  %v2126_v30 = vpop.permute.xlu2 %875  ;;  %v1015_v44 = vsel %vm410_vm0, %v1002_v2, %v1010_v17 }
 0x353   : > { %v2157_v18 = vmul.f32 %v1019_v23, %v1465_v14 }
 0x359   : > { %v978_v31 = vpop.permute.xlu0 %977  ;;  %v946_v29 = vpop.permute.xlu1 %945 }
 0x35a   : > { %v987_v3 = vsel %vm394_vm1, %v978_v31, %v970_v36  ;;  %v2130_v1 = vpop.permute.xlu2 %811  ;;  %v955_v45 = vsel %vm378_vm4, %v946_v29, %v2005_v4 }
 0x35b   : > { %2407 = vst [vmem:[#allocation20_spill] sm:$0xff] %v2130_v1  ;;  %v2142_v47 = vmul.f32 %v955_v45, %v1495_v38  ;;  %v1025_v45 = vmul.f32 %v1015_v44, %v1463_v13 }
 0x361   : > { %v882_v59 = vpop.permute.xlu0 %881  ;;  %v2135_v39 = vpop.permute.xlu1 %849 }
 0x362   : > { %v2137_v52 = vpop.permute.xlu2 %805 }
 0x369   : > { %v940_v34 = vpop.permute.xlu0 %939  ;;  %v908_v46 = vpop.permute.xlu1 %907 }
 0x36a   : > { %v948_v20 = vpop.permute.xlu2 %947 }
 0x36b   : > { %v956_v7 = vsel %vm378_vm4, %v948_v20, %v940_v34 }
 0x36c   : > { %v2145_v49 = vmul.f32 %v956_v7, %v1495_v38 }
 0x371   : > { %v844_v1 = vpop.permute.xlu0 %843  ;;  %v1012_v12 = vpop.permute.xlu1 %1011 }
 0x372   : > { %v1016_v11 = vsel %vm410_vm0, %v1004_v53, %v1012_v12  ;;  %v1020_v19 = vsel %vm410_vm0, %v1012_v12, %v1004_v53  ;;  %v923_v12 = vsel %vm362_vm5, %v914_v25, %v906_v40  ;;  %v2408_v25 = vpack.c.bf16 %v1986_v62, %v1980_v60 }
 0x373   : > { %v1027_v38 = vmul.f32 %v1016_v11, %v1463_v13  ;;  %v2161_v7 = vmul.f32 %v1020_v19, %v1465_v14  ;;  %v929_v14 = vmul.f32 %v923_v12, %v1518_v54  ;;  %v930_v19 = vmul.f32 %v919_v48, %v1520_v56 }
 0x374   : > { %v2190_v60 = vmul.f32 %v987_v3, %v1469_v16  ;;  %v952_v3 = vsel %vm378_vm4, %v940_v34, %v948_v20 }
 0x375   : > { %v1094_v17 = vpack.c.bf16 %v2161_v7, %v2157_v18  ;;  %v1093_v2 = vpack.c.bf16 %v1027_v38, %v1025_v45 }
 0x377   : > { %1132 = vmatpush.bf16.msrb.mxu2 %v1093_v2  ;;  %v983_v2 = vsel %vm394_vm1, %v970_v36, %v978_v31  ;;  %v2409_v36 = vpack.c.bf16 %v2014_v5, %v2008_v24  ;;  %v2410_v31 = vpack.c.bf16 %v2017_v10, %v2011_v28  ;;  %v891_v24 = vsel %vm346_vm6, %v882_v59, %v2120_v63 }
 0x378   : > { %v963_v28 = vmul.f32 %v952_v3, %v1493_v37 }
 0x379   : > { %v916_v44 = vpop.permute.xlu0 %915  ;;  %v2169_v53 = vpop.permute.xlu1 %813 }
 0x37a   : > { %v920_v11 = vsel %vm362_vm5, %v908_v46, %v916_v44  ;;  %v924_v13 = vsel %vm362_vm5, %v916_v44, %v908_v46  ;;  %v852_v46 = vpop.permute.xlu2 %851 }
 0x37b   : > { %v931_v23 = vmul.f32 %v924_v13, %v1518_v54  ;;  %v932_v45 = vmul.f32 %v920_v11, %v1520_v56  ;;  %1133 = vmatpush.bf16.msrb.mxu2 %v2408_v25  ;;  %v993_v56 = vmul.f32 %v983_v2, %v1467_v15 }
 0x37d   : > { %v1078_v40 = vpack.c.bf16 %v932_v45, %v930_v19  ;;  %v1077_v38 = vpack.c.bf16 %v931_v23, %v929_v14 }
 0x37f   : > { %1119 = vmatpush.bf16.msrb.mxu1 %v1077_v38  ;;  %1158 = vmatpush.bf16.msra.mxu3 %v1078_v40  ;;  %v860_v40 = vsel %vm330_vm8, %v852_v46, %v844_v1 }
 0x381   : > { %v818_v44 = vpop.permute.xlu0 %817  ;;  %v980_v12 = vpop.permute.xlu1 %979 }
 0x382   : > { %v984_v48 = vsel %vm394_vm1, %v972_v35, %v980_v12  ;;  %v988_v54 = vsel %vm394_vm1, %v980_v12, %v972_v35  ;;  %v816_v19 = vpop.permute.xlu2 %815  ;;  %v2413_v12 = vpack.c.bf16 %v2058_v51, %v2036_v9  ;;  %v1081_v9 = vpack.c.bf16 %v1891_v61, %v1862_v42  ;;  %v2415_v61 = vld [vmem:[#allocation4_spill] sm:$0xff] }
 0x383   : > { %v995_v62 = vmul.f32 %v984_v48, %v1467_v15  ;;  %v2194_v11 = vmul.f32 %v988_v54, %v1469_v16  ;;  %1120 = vmatpush.bf16.msrb.mxu1 %v2409_v36  ;;  %1159 = vmatpush.bf16.msra.mxu3 %v2410_v31  ;;  %v951_v15 = vsel %vm378_vm4, %v2005_v4, %v946_v29  ;;  %v2416_v54 = vld [vmem:[#allocation5_spill] sm:$0xff] }
 0x384   : > { %v887_v16 = vsel %vm346_vm6, %v2120_v63, %v882_v59  ;;  %v961_v14 = vmul.f32 %v951_v15, %v1493_v37  ;;  %v897_v4 = vmul.f32 %v891_v24, %v1523_v57  ;;  %v2411_v37 = vpack.c.bf16 %v2052_v43, %v2030_v32 }
 0x385   : > { %v1089_v13 = vpack.c.bf16 %v995_v62, %v993_v56  ;;  %v1090_v35 = vpack.c.bf16 %v2194_v11, %v2190_v60  ;;  %v898_v34 = vmul.f32 %v887_v16, %v1525_v58  ;;  %v867_v32 = vmul.f32 %v860_v40, %v1551_v21  ;;  %v2436_v11 = vld [vmem:[#allocation8_spill] sm:$0xff] }
 0x386   : > { %v1085_v45 = vpack.c.bf16 %v963_v28, %v961_v14  ;;  %v821_v42 = vsel %vm315_vm7, %v2137_v52, %v2169_v53 }
 0x387   : > { %1134 = vmatpush.bf16.msrb.mxu2 %v1089_v13  ;;  %v2417_v13 = vld [vmem:[#allocation2_spill] sm:$0xff] }
 0x389   : > { %v808_v5 = vpop.permute.xlu0 %807  ;;  %v884_v10 = vpop.permute.xlu1 %883 }
 0x38a   : > { %v888_v20 = vsel %vm346_vm6, %v2126_v30, %v884_v10  ;;  %v892_v29 = vsel %vm346_vm6, %v884_v10, %v2126_v30  ;;  %v856_v30 = vsel %vm330_vm8, %v844_v1, %v852_v46  ;;  %v2412_v46 = vpack.c.bf16 %v2089_v55, %v2082_v26  ;;  %v1042_v55 = vpop.permute.xlu2 %1041  ;;  %v2419_v10 = vld [vmem:[#allocation20_spill] sm:$0xff] }
 0x38b   : > { %v899_v59 = vmul.f32 %v892_v29, %v1523_v57  ;;  %v900_v63 = vmul.f32 %v888_v20, %v1525_v58  ;;  %1135 = vmatpush.bf16.msrb.mxu2 %v2411_v37  ;;  %v859_v57 = vsel %vm330_vm8, %v2135_v39, %v2045_v50  ;;  %v855_v58 = vsel %vm330_vm8, %v2045_v50, %v2135_v39 }
 0x38c   : > { %v868_v2 = vmul.f32 %v856_v30, %v1553_v22  ;;  %v865_v1 = vmul.f32 %v859_v57, %v1551_v21  ;;  %v866_v48 = vmul.f32 %v855_v58, %v1553_v22  ;;  %v2414_v39 = vpack.c.bf16 %v2092_v8, %v2086_v0  ;;  %v1061_v22 = vld [vmem:[%s2363_s6] sm:$0xff] }
 0x38d   : > { %v1073_v23 = vpack.c.bf16 %v899_v59, %v897_v4  ;;  %v1074_v25 = vpack.c.bf16 %v900_v63, %v898_v34  ;;  %v823_v50 = vsel %vm315_vm7, %v2122_v41, %v818_v44  ;;  %v827_v21 = vsel %vm315_vm7, %v818_v44, %v2122_v41  ;;  %v2421_v59 = vld [vmem:[#allocation16_spill] sm:$0xff] }
 0x38e   : > { %v1069_v26 = vpack.c.bf16 %v867_v32, %v865_v1  ;;  %v1070_v8 = vpack.c.bf16 %v868_v2, %v866_v48  ;;  %v1079_v41 = vpack.c.bf16 %v1834_v33, %v1812_v27  ;;  %v833_v44 = vmul.f32 %v827_v21, %v2415_v61  ;;  %v2418_v27 = vld [vmem:[#allocation3_spill] sm:$0xff] }
 0x38f   : > { %1121 = vmatpush.bf16.msrb.mxu1 %v1073_v23  ;;  %1136 = vmatpush.bf16.msrb.mxu2 %v1085_v45  ;;  %v834_v56 = vmul.f32 %v823_v50, %v2416_v54  ;;  %v1108_v62 = vunpack.c.h.b16 %v1061_v22  ;;  %v822_v36 = vsel %vm315_vm7, %v808_v5, %v816_v19  ;;  %v826_v31 = vsel %vm315_vm7, %v816_v19, %v808_v5  ;;  %v2420_v19 = vld [vmem:[#allocation18_spill] sm:$0xff]  ;;  %v2423_v45 = vld [vmem:[#allocation19_spill] sm:$0xff] }
 0x390   : > { %1160 = vmatpush.bf16.msra.mxu3 %v1074_v25  ;;  %v2422_v63 = vpack.c.bf16 %v2420_v19, %v2421_v59  ;;  %v825_v37 = vsel %vm315_vm7, %v2169_v53, %v2137_v52  ;;  %v831_v23 = vmul.f32 %v826_v31, %v2415_v61  ;;  %v2424_v25 = vld [vmem:[#allocation17_spill] sm:$0xff]  ;;  %v1107_v2 = vunpack.c.l.b16 %v1061_v22  ;;  %v1062_v50 = vld [vmem:[%s2363_s6 + $0x8] sm:$0xf] }
 0x391   : > { %v1034_v43 = vpop.permute.xlu0 %1033  ;;  %v1036_v38 = vpop.permute.xlu1 %1035  ;;  %v2425_v40 = vpack.c.bf16 %v2423_v45, %v2424_v25  ;;  %v1111_v30 = vpack.c.b16 %v1108_v62, %v1108_v62  ;;  %v829_v1 = vmul.f32 %v825_v37, %v2415_v61  ;;  %v830_v52 = vmul.f32 %v821_v42, %v2416_v54  ;;  %v2430_v62 = vld [vmem:[#allocation12_spill] sm:$0xff] }
 0x392   : > { %v1047_v51 = vsel %vm426_vm2, %v1034_v43, %v1042_v55  ;;  %v1051_v0 = vsel %vm426_vm2, %v1042_v55, %v1034_v43  ;;  %v1110_v48 = vpack.c.b16 %v1107_v2, %v1107_v2  ;;  %v2432_v31 = vpack.c.bf16 %v2145_v49, %v2142_v47 }
 0x393   : > { %1122 = vmatpush.bf16.msrb.mxu1 %v2412_v46  ;;  %1137 = vmatpush.bf16.msrb.mxu2 %v2413_v12  ;;  %v1057_v3 = vmul.f32 %v1047_v51, %v2417_v13  ;;  %v1058_v33 = vmul.f32 %v1051_v0, %v2418_v27  ;;  %v1063_v46 = vpack.c.bf16 %v831_v23, %v829_v1  ;;  %v1032_v51 = vpop.permute.xlu2 %1031  ;;  %v1109_v0 = vunpack.c.l.b16 %v1062_v50 }
 0x394   : > { %1161 = vmatpush.bf16.msra.mxu3 %v2414_v39 }
 0x397   : > { %1123 = vmatpush.bf16.msrb.mxu1 %v1069_v26  ;;  %1138 = vmatpush.bf16.msrb.mxu2 %v1081_v9  ;;  %v2426_v26 = vld [vmem:[#allocation11_spill] sm:$0xff]  ;;  %v2427_v9 = vld [vmem:[#allocation10_spill] sm:$0xff] }
 0x398   : > { %1162 = vmatpush.bf16.msra.mxu3 %v1070_v8  ;;  %v2428_v22 = vpack.c.bf16 %v2426_v26, %v2427_v9 }
 0x399   : > { %v1044_v15 = vpop.permute.xlu0 %1043  ;;  %v820_v16 = vpop.permute.xlu1 %819 }
 0x39a   : > { %v1048_v24 = vsel %vm426_vm2, %v1036_v38, %v1044_v15  ;;  %v1052_v28 = vsel %vm426_vm2, %v1044_v15, %v1036_v38  ;;  %v824_v14 = vsel %vm315_vm7, %v2419_v10, %v820_v16  ;;  %v828_v5 = vsel %vm315_vm7, %v820_v16, %v2419_v10  ;;  %v2439_v15 = vld [vmem:[#allocation7_spill] sm:$0xff] }
 0x39b   : > { %v1059_v20 = vmul.f32 %v1048_v24, %v2417_v13  ;;  %v1060_v29 = vmul.f32 %v1052_v28, %v2418_v27  ;;  %v835_v4 = vmul.f32 %v828_v5, %v2415_v61  ;;  %v836_v34 = vmul.f32 %v824_v14, %v2416_v54  ;;  %1124 = vmatpush.bf16.msrb.mxu1 %v2422_v63  ;;  %v1103_v10 = vpop.permute.xlu2 %1102 }
 0x39c   : > { %1139 = vmatpush.bf16.msrb.mxu2 %v1079_v41  ;;  %1163 = vmatpush.bf16.msra.mxu3 %v2425_v40  ;;  %v832_v38 = vmul.f32 %v822_v36, %v2416_v54  ;;  %v2431_v36 = vpack.c.bf16 %v2429_v6, %v2430_v62 }
 0x39d   : > { %v1097_v57 = vpack.c.bf16 %v1059_v20, %v1057_v3  ;;  %v1098_v58 = vpack.c.bf16 %v1060_v29, %v1058_v33  ;;  %v1065_v32 = vpack.c.bf16 %v835_v4, %v833_v44  ;;  %v1066_v43 = vpack.c.bf16 %v836_v34, %v834_v56  ;;  %v2434_v3 = vld [vmem:[#allocation13_spill] sm:$0xff]  ;;  %v2438_v33 = vld [vmem:[#allocation6_spill] sm:$0xff] }
 0x39e   : > { %v1064_v12 = vpack.c.bf16 %v832_v38, %v830_v52  ;;  %v1112_v56 = vpack.c.b16 %v1109_v0, %v1109_v0  ;;  %v1080_v16 = vpack.c.bf16 %v2439_v15, %v2438_v33 }
 0x39f   : > { %1125 = vmatpush.bf16.msrb.mxu1 %v1065_v32  ;;  %1151 = vmatpush.bf16.msra.mxu0 %v1097_v57 }
 0x3a0   : > { %1164 = vmatpush.bf16.msra.mxu3 %v1066_v43  ;;  %1190 = vmatpush.bf16.msra.mxu2 %v1098_v58 }
 0x3a1   : > { %v1030_v53 = vpop.permute.xlu1 %1029  ;;  %1140 = vmatmul.bf16.vlgmr.msrb.gmra.mxu2 %v1111_v30  ;;  %v1038_v39 = vpop.permute.xlu0 %1037 }
 0x3a2   : > { %v1045_v21 = vsel %vm426_vm2, %v1030_v53, %v1038_v39  ;;  %v1049_v55 = vsel %vm426_vm2, %v1038_v39, %v1030_v53 }
 0x3a3   : > { %1126 = vmatpush.bf16.msrb.mxu1 %v1063_v46  ;;  %v1053_v8 = vmul.f32 %v1045_v21, %v2417_v13  ;;  %v1054_v41 = vmul.f32 %v1049_v55, %v2418_v27 }
 0x3a4   : > { %1165 = vmatpush.bf16.msra.mxu3 %v1064_v12 }
 0x3a6   : > { %1127 = vmatmul.bf16.vlgmr.msrb.gmra.mxu1 %v1110_v48 }
 0x3a7   : > { %1171 = vmatpush.bf16.msra.mxu1 %v1094_v17  ;;  %1166 = vmatmul.bf16.vlgmr.msra.gmra.mxu3 %v1110_v48 }
 0x3a9   : > { %v1040_v18 = vpop.permute.xlu1 %1039 }
 0x3aa   : > { %v1046_v7 = vsel %vm426_vm2, %v1032_v51, %v1040_v18  ;;  %v1050_v17 = vsel %vm426_vm2, %v1040_v18, %v1032_v51 }
 0x3ab   : > { %1172 = vmatpush.bf16.msra.mxu1 %v2428_v22  ;;  %v1055_v42 = vmul.f32 %v1046_v7, %v2417_v13  ;;  %v1056_v61 = vmul.f32 %v1050_v17, %v2418_v27  ;;  %v2433_v13 = vld [vmem:[#allocation15_spill] sm:$0xff] }
 0x3ac   : > { %v2435_v60 = vpack.c.bf16 %v2433_v13, %v2434_v3 }
 0x3ad   : > { %v1095_v44 = vpack.c.bf16 %v1055_v42, %v1053_v8  ;;  %v1096_v54 = vpack.c.bf16 %v1056_v61, %v1054_v41 }
 0x3af   : > { %1173 = vmatpush.bf16.msra.mxu1 %v1090_v35  ;;  %1152 = vmatpush.bf16.msra.mxu0 %v1095_v44  ;;  %v2437_v35 = vld [vmem:[#allocation9_spill] sm:$0xff] }
 0x3b0   : > { %1191 = vmatpush.bf16.msra.mxu2 %v1096_v54  ;;  %v1082_v27 = vpack.c.bf16 %v2437_v35, %v2436_v11 }
 0x3b2   : > { %1300 = vmatmul.msk.bf16.vlgmr.msra.gmra.mxu0 %vm1115_vm11, %v1112_v56 }
 0x3b3   : > { %1174 = vmatpush.bf16.msra.mxu1 %v2431_v36  ;;  %1301 = vmatmul.msk.bf16.vlgmr.msra.gmra.mxu2 %vm1115_vm11, %v1112_v56 }
 0x3b7   : > { %1175 = vmatpush.bf16.msra.mxu1 %v2432_v31 }
 0x3bb   : > { %1176 = vmatpush.bf16.msra.mxu1 %v2435_v60 }
 0x3bf   : > { %1177 = vmatpush.bf16.msra.mxu1 %v1082_v27 }
 0x3c3   : > { %1178 = vmatpush.bf16.msra.mxu1 %v1080_v16 }
 0x3c6   : > { %1179 = vmatmul.bf16.vlgmr.msra.gmra.mxu1 %v1111_v30 }
 0x423   : > { %v1128_v24 = vpop.f32.mrf.mxu1 }
 0x424   : > { %v1141_v28 = vpop.f32.mrf.mxu2  ;;  %v1129_v14 = vadd.f32 %v1128_v24, %v1103_v10 }
 0x426   : > { %v1142_v20 = vadd.f32 %v1141_v28, %v1129_v14 }
 0x42a   : > { %v1167_v49 = vpop.f32.mrf.mxu3 }
 0x42b   : > { %v1130_v47 = vpop.f32.mrf.mxu1  ;;  %v1168_v45 = vadd.f32 %v1167_v49, %v1103_v10 }
 0x42c   : > { %v1143_v5 = vpop.f32.mrf.mxu2 }
 0x42f   : > { %v1154_v29 = vpop.f32.mrf.mxu0 }
 0x430   : > { %v1155_v4 = vadd.f32 %v1154_v29, %v1142_v20 }
 0x432   : > { %v1197_v34 = vmul.f32 0.2, %v1155_v4  ;;  %v1169_v19 = vpop.f32.mrf.mxu3 }
 0x434   : > { %v1199_v59 = vmax.f32 %v1197_v34, %v1155_v4 }
 0x436   : > { %v1193_v63 = vpop.f32.mrf.mxu2  ;;  %1201 = vst [vmem:[%s305_s21] sm:$0xff] %v1199_v59 }
 0x437   : > { %v1156_v37 = vpop.f32.mrf.mxu0 }
 0x43e   : > { %v1195_v23 = vpop.f32.mrf.mxu2 }
 0x443   : > { %v1180_v25 = vpop.f32.mrf.mxu1 }
 0x444   : > { %v1181_v40 = vadd.f32 %v1180_v25, %v1168_v45 }
 0x446   : > { %v1194_v30 = vadd.f32 %v1193_v63, %v1181_v40 }
 0x448   : > { %v1198_v57 = vmul.f32 0.2, %v1194_v30 }
 0x44a   : > { %v1200_v58 = vmax.f32 %v1198_v57, %v1194_v30 }
 0x44b   : > { %v1182_v32 = vpop.f32.mrf.mxu1 }
 0x44c   : > { %1202 = vst [vmem:[%s305_s21 + $0x8] sm:$0xff] %v1200_v58 }
 0x44d PF: > { %s18_s27 = sadd.s32 1, %s1337_s27  }
 0x44e   : > { %p15_p4 = scmp.ge.s32.totalorder %s18_s27, 4  }
 0x450   :  { %17 = sbr.rel (!%p15_p4) target bundleno = 1 (0x1), region = 89 }

</bundles_post_ra>
